<compile_context>
chip_gen: v6e
topology: v6e:2x2x1
jax: 0.10.0
libtpu: 0.0.40
codegen_flags: <defaults>
</compile_context>

<pallas_src>
import jax
import jax.numpy as jnp
from jax.experimental import pallas as pl
from jax.experimental.pallas import tpu as pltpu

# ----------------------------- configuration -------------------------------
HIDDEN_SIZE = 32
MULTI_HEAD = 4
HIDDEN_SIZE_HEAD = HIDDEN_SIZE // MULTI_HEAD
FF_SIZE = 64
LN_EPS = 1e-6          # MCAN custom LayerNorm eps
LANE = 128             # lane width of the packed parameter slabs

B = 2                  # batch
S = 8                  # sequence length
BS = B * S


# ------------------------------ kernel body ---------------------------------
def _layernorm(x, gamma, beta):
    """MCAN LayerNorm (unbiased std, eps added to the std) on (R, H) f32 data."""
    n = jnp.float32(HIDDEN_SIZE)
    mean = jnp.sum(x, axis=-1, keepdims=True) * (1.0 / n)
    xc = x - mean
    var = jnp.sum(xc * xc, axis=-1, keepdims=True) * (1.0 / (n - 1.0))
    return gamma * (xc / (jnp.sqrt(var) + jnp.float32(LN_EPS))) + beta


def sa_kernel(x_ref, w_ref, b_ref, out_ref):
    H, dh, MH, F = HIDDEN_SIZE, HIDDEN_SIZE_HEAD, MULTI_HEAD, FF_SIZE

    x = x_ref[...]                                   # (BS, 32) f32
    xb = x.astype(jnp.bfloat16)                      # MXU operand only

    # --- fused Q/K/V projection: one lane-dense MXU push ---
    # w_ref rows 0:32 hold [wq | wk | wv | 0] (bf16); lanes 96:128 stay zero.
    qkv = jnp.dot(xb, w_ref[0:H, :],
                  preferred_element_type=jnp.float32) + b_ref[0:1, :]   # (BS, 128)

    # --- batched multi-head attention (all 4 heads at once) ---
    def split_heads(t):                              # (BS, H) -> (B*MH, S, dh)
        return t.reshape(B, S, MH, dh).swapaxes(1, 2).reshape(B * MH, S, dh)

    q = split_heads(qkv[:, 0:H])
    k = split_heads(qkv[:, H:2 * H])
    v = split_heads(qkv[:, 2 * H:3 * H])

    scale = jnp.float32(1.0 / (dh ** 0.5))
    # additive mask bias (0 / -1e9), packed in b_slab rows 8:8+B, lanes 0:S
    mbias = jnp.broadcast_to(b_ref[8:8 + B, 0:S][:, None, None, :],
                             (B, MH, 1, S)).reshape(B * MH, 1, S)

    s = jnp.einsum('bqd,bkd->bqk', q, k,
                   preferred_element_type=jnp.float32) * scale          # (B*MH,S,S)
    s = s + mbias
    s = s - jnp.max(s, axis=-1, keepdims=True)
    p = jnp.exp(s)
    p = p * pl.reciprocal(jnp.sum(p, axis=-1, keepdims=True), approx=True)  # EUP
    ctx = jnp.einsum('bqk,bkd->bqd', p, v,
                     preferred_element_type=jnp.float32)                 # (B*MH,S,dh)

    atted = ctx.reshape(B, MH, S, dh).swapaxes(1, 2).reshape(BS, H)      # concat heads
    merged = jnp.dot(atted.astype(jnp.bfloat16), w_ref[H:2 * H, 0:H],
                     preferred_element_type=jnp.float32) + b_ref[1:2, 0:H]

    # --- residual + LayerNorm 1 ---
    x1 = _layernorm(x + merged, b_ref[4:5, 0:H], b_ref[5:6, 0:H])

    # --- FFN: Linear -> ReLU -> Linear (w2 packed as two 32x32 halves) ---
    h1 = jnp.dot(x1.astype(jnp.bfloat16), w_ref[2 * H:3 * H, 0:F],
                 preferred_element_type=jnp.float32) + b_ref[2:3, 0:F]
    h1 = jnp.maximum(h1, 0.0).astype(jnp.bfloat16)
    ffn = (jnp.dot(h1[:, 0:H], w_ref[3 * H:4 * H, 0:H],
                   preferred_element_type=jnp.float32)
           + jnp.dot(h1[:, H:2 * H], w_ref[3 * H:4 * H, H:2 * H],
                     preferred_element_type=jnp.float32)
           + b_ref[3:4, 0:H])

    # --- residual + LayerNorm 2 ---
    x2 = _layernorm(x1 + ffn, b_ref[6:7, 0:H], b_ref[7:8, 0:H])

    out_ref[...] = x2.astype(out_ref.dtype)


# ------------------------------- wrapper -------------------------------------
@jax.jit
def self_attn_forward(x, w_slab, b_slab):
    """x: (B, S, H) f32; w_slab: (128,128) bf16; b_slab: (16,128) f32
    (rows 0..7 biases/LN params, rows 8:8+B the additive attention mask bias)."""
    xp = x.reshape(BS, HIDDEN_SIZE)                  # free (contiguous) reshape

    out = pl.pallas_call(
        sa_kernel,
        out_shape=jax.ShapeDtypeStruct((BS, HIDDEN_SIZE), jnp.float32),
        grid_spec=pltpu.PrefetchScalarGridSpec(
            num_scalar_prefetch=0,
            grid=(1,),                               # single invocation
            in_specs=[
                pl.BlockSpec((BS, HIDDEN_SIZE), lambda i: (0, 0)),   # x  (block == full array)
                pl.BlockSpec((LANE, LANE), lambda i: (0, 0)),        # bf16 weight slab
                pl.BlockSpec((16, LANE), lambda i: (0, 0)),          # f32 bias/LN/mask slab
            ],
            out_specs=pl.BlockSpec((BS, HIDDEN_SIZE), lambda i: (0, 0)),
        ),
        compiler_params=pltpu.CompilerParams(
            dimension_semantics=("arbitrary",),      # tiny work: do not shard
        ),
    )(xp, w_slab, b_slab)

    return out.reshape(B, S, HIDDEN_SIZE)


# ----------------------------- parameter packing -----------------------------
def init_params(key):
    """Deterministic parameter init. Weights stored as (in, out) so the kernel
    computes y = x @ W + b (equivalent to torch Linear with W = weight.T)."""
    ks = jax.random.split(key, 8)
    scale = 0.02
    wq = scale * jax.random.normal(ks[0], (HIDDEN_SIZE, HIDDEN_SIZE), jnp.float32)
    wk = scale * jax.random.normal(ks[1], (HIDDEN_SIZE, HIDDEN_SIZE), jnp.float32)
    wv = scale * jax.random.normal(ks[2], (HIDDEN_SIZE, HIDDEN_SIZE), jnp.float32)
    wm = scale * jax.random.normal(ks[3], (HIDDEN_SIZE, HIDDEN_SIZE), jnp.float32)
    w1 = scale * jax.random.normal(ks[4], (HIDDEN_SIZE, FF_SIZE), jnp.float32)
    w2 = scale * jax.random.normal(ks[5], (FF_SIZE, HIDDEN_SIZE), jnp.float32)
    bq = 0.01 * jax.random.normal(ks[6], (1, HIDDEN_SIZE), jnp.float32)
    bk = jnp.zeros((1, HIDDEN_SIZE), jnp.float32)
    bv = jnp.zeros((1, HIDDEN_SIZE), jnp.float32)
    bm = jnp.zeros((1, HIDDEN_SIZE), jnp.float32)
    b1 = jnp.zeros((1, FF_SIZE), jnp.float32)
    b2 = jnp.zeros((1, HIDDEN_SIZE), jnp.float32)
    g1 = jnp.ones((1, HIDDEN_SIZE), jnp.float32)    # LayerNorm a_2
    be1 = jnp.zeros((1, HIDDEN_SIZE), jnp.float32)  # LayerNorm b_2
    g2 = jnp.ones((1, HIDDEN_SIZE), jnp.float32)
    be2 = jnp.zeros((1, HIDDEN_SIZE), jnp.float32)
    return (wq, bq, wk, bk, wv, bv, wm, bm, g1, be1, w1, b1, w2, b2, g2, be2)


def pack_params(params, x_mask_f):
    """Pack parameters + the additive attention mask bias into two slabs.

    w_slab (128, 128) bf16:
        rows  0:32 , lanes 0:96 -> [wq | wk | wv]
        rows 32:64 , lanes 0:32 -> wm
        rows 64:96 , lanes 0:64 -> w1
        rows 96:128, lanes 0:64 -> [w2[0:32,:] | w2[32:64,:]]
    b_slab (16, 128) f32:
        rows 0..7 -> bqkv, bm, b1, b2, g1, be1, g2, be2 (zero-padded)
        rows 8:8+B, lanes 0:S -> additive mask bias (-1e9 on padded key tokens)
    For a per-call mask, only rows 8:8+B need to be refreshed (single tiny set).
    """
    (wq, bq, wk, bk, wv, bv, wm, bm, g1, be1, w1, b1, w2, b2, g2, be2) = params
    H, F, W = HIDDEN_SIZE, FF_SIZE, LANE

    w_slab = jnp.zeros((W, W), jnp.float32)
    w_slab = w_slab.at[0:H, 0:H].set(wq)
    w_slab = w_slab.at[0:H, H:2 * H].set(wk)
    w_slab = w_slab.at[0:H, 2 * H:3 * H].set(wv)
    w_slab = w_slab.at[H:2 * H, 0:H].set(wm)
    w_slab = w_slab.at[2 * H:3 * H, 0:F].set(w1)
    w_slab = w_slab.at[3 * H:4 * H, 0:H].set(w2[0:H, :])
    w_slab = w_slab.at[3 * H:4 * H, H:2 * H].set(w2[H:2 * H, :])
    w_slab = w_slab.astype(jnp.bfloat16)

    b_slab = jnp.zeros((16, W), jnp.float32)
    b_slab = b_slab.at[0, 0:H].set(bq[0])
    b_slab = b_slab.at[0, H:2 * H].set(bk[0])
    b_slab = b_slab.at[0, 2 * H:3 * H].set(bv[0])
    b_slab = b_slab.at[1, 0:H].set(bm[0])
    b_slab = b_slab.at[2, 0:F].set(b1[0])
    b_slab = b_slab.at[3, 0:H].set(b2[0])
    b_slab = b_slab.at[4, 0:H].set(g1[0])
    b_slab = b_slab.at[5, 0:H].set(be1[0])
    b_slab = b_slab.at[6, 0:H].set(g2[0])
    b_slab = b_slab.at[7, 0:H].set(be2[0])
    b_slab = b_slab.at[8:8 + B, 0:S].set(x_mask_f * jnp.float32(-1e9))
    return w_slab, b_slab


# ----------------------------- pure-JAX reference -----------------------------
def reference_forward(x, mask_bool, params):
    """Mirrors the PyTorch _SA forward (MHAtt + FFN, residual + MCAN LayerNorm)."""
    (wq, bq, wk, bk, wv, bv, wm, bm, g1, be1, w1, b1, w2, b2, g2, be2) = params

    def ln(t, g, be):
        mean = jnp.mean(t, axis=-1, keepdims=True)
        var = jnp.sum((t - mean) ** 2, axis=-1, keepdims=True) / (t.shape[-1] - 1)
        return g * (t - mean) / (jnp.sqrt(var) + LN_EPS) + be

    q = x @ wq + bq
    k = x @ wk + bk
    v = x @ wv + bv

    def split(t):
        return t.reshape(B, S, MULTI_HEAD, HIDDEN_SIZE_HEAD).transpose(0, 2, 1, 3)

    qh, kh, vh = split(q), split(k), split(v)                      # (B,MH,S,dh)
    scores = jnp.einsum('bhqd,bhkd->bhqk', qh, kh) / jnp.sqrt(
        jnp.float32(HIDDEN_SIZE_HEAD))
    scores = jnp.where(mask_bool, jnp.float32(-1e9), scores)       # (B,1,1,S) bcast
    p = jax.nn.softmax(scores, axis=-1)
    ctx = jnp.einsum('bhqk,bhkd->bhqd', p, vh).transpose(0, 2, 1, 3).reshape(
        B, S, HIDDEN_SIZE)
    merged = ctx @ wm + bm
    x1 = ln(x + merged, g1, be1)
    ffn = jnp.maximum(x1 @ w1 + b1, 0.0) @ w2 + b2
    return ln(x1 + ffn, g2, be2)


# ---------------------------------- main --------------------------------------
if __name__ == "__main__":
    key = jax.random.PRNGKey(0)
    k_x, k_p = jax.random.split(key)

    # inputs[0]: (B, S, H) features
    x = jax.random.normal(k_x, (B, S, HIDDEN_SIZE), jnp.float32)

    # masks[0]: boolean (B, 1, 1, S), True = padded token (MCAN make_mask style)
    x_mask_bool = jnp.zeros((B, 1, 1, S), jnp.bool_)
    x_mask_bool = x_mask_bool.at[1, 0, 0, S - 2:].set(True)   # pad last 2 tokens of item 1
    x_mask_f = x_mask_bool.astype(jnp.float32).reshape(B, S)

    params = init_params(k_p)
    w_slab, b_slab = pack_params(params, x_mask_f)

    out = self_attn_forward(x, w_slab, b_slab)
    jax.block_until_ready(out)

    assert out.shape == (B, S, HIDDEN_SIZE) and out.dtype == jnp.float32
    assert bool(jnp.all(jnp.isfinite(out)))

    ref = reference_forward(x, x_mask_bool, params)
    err = float(jnp.max(jnp.abs(out - ref)))
    assert bool(jnp.allclose(out, ref, rtol=2e-2, atol=2e-2)), err

    print("KERNEL_OK")
</pallas_src>

<mosaic_0001>
module attributes {stable_mosaic.version = 11 : i64} {
  func.func @sa_kernel(%arg0: i32, %arg1: memref<16x32xf32, #tpu.memory_space<vmem>>, %arg2: memref<128x128xbf16, #tpu.memory_space<vmem>>, %arg3: memref<16x128xf32, #tpu.memory_space<vmem>>, %arg4: memref<16x32xf32, #tpu.memory_space<vmem>>) attributes {dimension_semantics = [#tpu.dimension_semantics<arbitrary>], iteration_bounds = array<i64: 1>, scalar_prefetch = 0 : i64, scratch_operands = 0 : i64, tpu.core_type = #tpu.core_type<tc>, window_params = [{pipeline_mode = #tpu.pipeline_mode<synchronous>, transform_indices = @transform_0, window_bounds = array<i64: 16, 32>}, {pipeline_mode = #tpu.pipeline_mode<synchronous>, transform_indices = @transform_1, window_bounds = array<i64: 128, 128>}, {pipeline_mode = #tpu.pipeline_mode<synchronous>, transform_indices = @transform_2, window_bounds = array<i64: 16, 128>}, {pipeline_mode = #tpu.pipeline_mode<synchronous>, transform_indices = @transform_3, window_bounds = array<i64: 16, 32>}]} {
    %c0 = arith.constant 0 : index
    %c0_0 = arith.constant 0 : index
    %0 = vector.load %arg1[%c0, %c0_0] : memref<16x32xf32, #tpu.memory_space<vmem>>, vector<16x32xf32>
    %1 = arith.truncf %0 : vector<16x32xf32> to vector<16x32xbf16>
    %c0_1 = arith.constant 0 : index
    %c0_2 = arith.constant 0 : index
    %2 = vector.load %arg2[%c0_1, %c0_2] : memref<128x128xbf16, #tpu.memory_space<vmem>>, vector<32x128xbf16>
    %cst = arith.constant dense<0.000000e+00> : vector<16x128xf32>
    %3 = tpu.matmul %1, %2, %cst {dimension_numbers = #tpu.dot_dimension_numbers<[1], [0], [0], [1], [0, 0, 1, 1], [], []>} : vector<16x32xbf16>, vector<32x128xbf16>, vector<16x128xf32> -> vector<16x128xf32>
    %c0_3 = arith.constant 0 : index
    %c0_4 = arith.constant 0 : index
    %4 = vector.load %arg3[%c0_3, %c0_4] : memref<16x128xf32, #tpu.memory_space<vmem>>, vector<1x128xf32>
    %5 = vector.broadcast %4 : vector<1x128xf32> to vector<16x128xf32>
    %6 = arith.addf %3, %5 : vector<16x128xf32>
    %7 = vector.extract_strided_slice %6 {offsets = [0, 0], sizes = [16, 32], strides = [1, 1]} : vector<16x128xf32> to vector<16x32xf32>
    %8 = vector.shape_cast %7 : vector<16x32xf32> to vector<2x8x4x8xf32>
    %9 = tpu.transpose %8, [0, 2, 1, 3] : vector<2x8x4x8xf32> -> vector<2x4x8x8xf32>
    %10 = vector.shape_cast %9 : vector<2x4x8x8xf32> to vector<8x8x8xf32>
    %11 = vector.extract_strided_slice %6 {offsets = [0, 32], sizes = [16, 32], strides = [1, 1]} : vector<16x128xf32> to vector<16x32xf32>
    %12 = vector.shape_cast %11 : vector<16x32xf32> to vector<2x8x4x8xf32>
    %13 = tpu.transpose %12, [0, 2, 1, 3] : vector<2x8x4x8xf32> -> vector<2x4x8x8xf32>
    %14 = vector.shape_cast %13 : vector<2x4x8x8xf32> to vector<8x8x8xf32>
    %15 = vector.extract_strided_slice %6 {offsets = [0, 64], sizes = [16, 32], strides = [1, 1]} : vector<16x128xf32> to vector<16x32xf32>
    %16 = vector.shape_cast %15 : vector<16x32xf32> to vector<2x8x4x8xf32>
    %17 = tpu.transpose %16, [0, 2, 1, 3] : vector<2x8x4x8xf32> -> vector<2x4x8x8xf32>
    %18 = vector.shape_cast %17 : vector<2x4x8x8xf32> to vector<8x8x8xf32>
    %c8 = arith.constant 8 : index
    %c0_5 = arith.constant 0 : index
    %19 = vector.load %arg3[%c8, %c0_5] : memref<16x128xf32, #tpu.memory_space<vmem>>, vector<2x8xf32>
    %20 = vector.shape_cast %19 : vector<2x8xf32> to vector<2x1x1x8xf32>
    %21 = vector.shape_cast %20 : vector<2x1x1x8xf32> to vector<2x1x1x8xf32>
    %22 = vector.broadcast %21 : vector<2x1x1x8xf32> to vector<2x4x1x8xf32>
    %23 = vector.shape_cast %22 : vector<2x4x1x8xf32> to vector<8x1x8xf32>
    "tpu.trace_start"() <{level = 10 : i32, message = "bqd,bkd->bqk"}> : () -> ()
    %cst_6 = arith.constant dense<0.000000e+00> : vector<8x8x8xf32>
    %24 = tpu.matmul %10, %14, %cst_6 {dimension_numbers = #tpu.dot_dimension_numbers<[2], [2], [1], [1], [0, 0, 0, 1, 1, 1], [0], [0]>} : vector<8x8x8xf32>, vector<8x8x8xf32>, vector<8x8x8xf32> -> vector<8x8x8xf32>
    "tpu.trace_stop"() : () -> ()
    %cst_7 = arith.constant 0.353553385 : f32
    %25 = vector.broadcast %cst_7 : f32 to vector<8x8x8xf32>
    %26 = arith.mulf %24, %25 : vector<8x8x8xf32>
    %27 = vector.broadcast %23 : vector<8x1x8xf32> to vector<8x8x8xf32>
    %28 = arith.addf %26, %27 : vector<8x8x8xf32>
    %cst_8 = arith.constant dense<0xFF800000> : vector<8x8xf32>
    %29 = vector.multi_reduction <maximumf>, %28, %cst_8 [2] : vector<8x8x8xf32> to vector<8x8xf32>
    %30 = vector.shape_cast %29 : vector<8x8xf32> to vector<8x8x1xf32>
    %31 = vector.broadcast %30 : vector<8x8x1xf32> to vector<8x8x8xf32>
    %32 = arith.subf %28, %31 : vector<8x8x8xf32>
    %33 = math.exp %32 : vector<8x8x8xf32>
    %cst_9 = arith.constant dense<0.000000e+00> : vector<8x8xf32>
    %34 = vector.multi_reduction <add>, %33, %cst_9 [2] : vector<8x8x8xf32> to vector<8x8xf32>
    %35 = vector.shape_cast %34 : vector<8x8xf32> to vector<8x8x1xf32>
    %36 = tpu.reciprocal %35 {approx = true} : vector<8x8x1xf32> -> vector<8x8x1xf32>
    %37 = vector.broadcast %36 : vector<8x8x1xf32> to vector<8x8x8xf32>
    %38 = arith.mulf %33, %37 : vector<8x8x8xf32>
    "tpu.trace_start"() <{level = 10 : i32, message = "bqk,bkd->bqd"}> : () -> ()
    %cst_10 = arith.constant dense<0.000000e+00> : vector<8x8x8xf32>
    %39 = tpu.matmul %38, %18, %cst_10 {dimension_numbers = #tpu.dot_dimension_numbers<[2], [1], [1], [2], [0, 0, 0, 1, 1, 2], [0], [0]>} : vector<8x8x8xf32>, vector<8x8x8xf32>, vector<8x8x8xf32> -> vector<8x8x8xf32>
    "tpu.trace_stop"() : () -> ()
    %40 = vector.shape_cast %39 : vector<8x8x8xf32> to vector<2x4x8x8xf32>
    %41 = tpu.transpose %40, [0, 2, 1, 3] : vector<2x4x8x8xf32> -> vector<2x8x4x8xf32>
    %42 = vector.shape_cast %41 : vector<2x8x4x8xf32> to vector<16x32xf32>
    %43 = arith.truncf %42 : vector<16x32xf32> to vector<16x32xbf16>
    %c32 = arith.constant 32 : index
    %c0_11 = arith.constant 0 : index
    %44 = vector.load %arg2[%c32, %c0_11] : memref<128x128xbf16, #tpu.memory_space<vmem>>, vector<32x32xbf16>
    %cst_12 = arith.constant dense<0.000000e+00> : vector<16x32xf32>
    %45 = tpu.matmul %43, %44, %cst_12 {dimension_numbers = #tpu.dot_dimension_numbers<[1], [0], [0], [1], [0, 0, 1, 1], [], []>} : vector<16x32xbf16>, vector<32x32xbf16>, vector<16x32xf32> -> vector<16x32xf32>
    %c1 = arith.constant 1 : index
    %c0_13 = arith.constant 0 : index
    %46 = vector.load %arg3[%c1, %c0_13] : memref<16x128xf32, #tpu.memory_space<vmem>>, vector<1x32xf32>
    %47 = vector.broadcast %46 : vector<1x32xf32> to vector<16x32xf32>
    %48 = arith.addf %45, %47 : vector<16x32xf32>
    %49 = arith.addf %0, %48 : vector<16x32xf32>
    %c4 = arith.constant 4 : index
    %c0_14 = arith.constant 0 : index
    %50 = vector.load %arg3[%c4, %c0_14] : memref<16x128xf32, #tpu.memory_space<vmem>>, vector<1x32xf32>
    %c5 = arith.constant 5 : index
    %c0_15 = arith.constant 0 : index
    %51 = vector.load %arg3[%c5, %c0_15] : memref<16x128xf32, #tpu.memory_space<vmem>>, vector<1x32xf32>
    %cst_16 = arith.constant dense<0.000000e+00> : vector<16xf32>
    %52 = vector.multi_reduction <add>, %49, %cst_16 [1] : vector<16x32xf32> to vector<16xf32>
    %53 = vector.shape_cast %52 : vector<16xf32> to vector<16x1xf32>
    %cst_17 = arith.constant 1.000000e+00 : f32
    %cst_18 = arith.constant 3.200000e+01 : f32
    %54 = arith.divf %cst_17, %cst_18 : f32
    %55 = vector.broadcast %54 : f32 to vector<16x1xf32>
    %56 = arith.mulf %53, %55 : vector<16x1xf32>
    %57 = vector.broadcast %56 : vector<16x1xf32> to vector<16x32xf32>
    %58 = arith.subf %49, %57 : vector<16x32xf32>
    %59 = arith.mulf %58, %58 : vector<16x32xf32>
    %cst_19 = arith.constant dense<0.000000e+00> : vector<16xf32>
    %60 = vector.multi_reduction <add>, %59, %cst_19 [1] : vector<16x32xf32> to vector<16xf32>
    %61 = vector.shape_cast %60 : vector<16xf32> to vector<16x1xf32>
    %cst_20 = arith.constant 3.200000e+01 : f32
    %cst_21 = arith.constant 1.000000e+00 : f32
    %62 = arith.subf %cst_20, %cst_21 : f32
    %cst_22 = arith.constant 1.000000e+00 : f32
    %63 = arith.divf %cst_22, %62 : f32
    %64 = vector.broadcast %63 : f32 to vector<16x1xf32>
    %65 = arith.mulf %61, %64 : vector<16x1xf32>
    %66 = math.sqrt %65 : vector<16x1xf32>
    %cst_23 = arith.constant 9.99999997E-7 : f32
    %67 = vector.broadcast %cst_23 : f32 to vector<16x1xf32>
    %68 = arith.addf %66, %67 : vector<16x1xf32>
    %69 = vector.broadcast %68 : vector<16x1xf32> to vector<16x32xf32>
    %70 = arith.divf %58, %69 : vector<16x32xf32>
    %71 = vector.broadcast %50 : vector<1x32xf32> to vector<16x32xf32>
    %72 = arith.mulf %71, %70 : vector<16x32xf32>
    %73 = vector.broadcast %51 : vector<1x32xf32> to vector<16x32xf32>
    %74 = arith.addf %72, %73 : vector<16x32xf32>
    %75 = arith.truncf %74 : vector<16x32xf32> to vector<16x32xbf16>
    %c64 = arith.constant 64 : index
    %c0_24 = arith.constant 0 : index
    %76 = vector.load %arg2[%c64, %c0_24] : memref<128x128xbf16, #tpu.memory_space<vmem>>, vector<32x64xbf16>
    %cst_25 = arith.constant dense<0.000000e+00> : vector<16x64xf32>
    %77 = tpu.matmul %75, %76, %cst_25 {dimension_numbers = #tpu.dot_dimension_numbers<[1], [0], [0], [1], [0, 0, 1, 1], [], []>} : vector<16x32xbf16>, vector<32x64xbf16>, vector<16x64xf32> -> vector<16x64xf32>
    %c2 = arith.constant 2 : index
    %c0_26 = arith.constant 0 : index
    %78 = vector.load %arg3[%c2, %c0_26] : memref<16x128xf32, #tpu.memory_space<vmem>>, vector<1x64xf32>
    %79 = vector.broadcast %78 : vector<1x64xf32> to vector<16x64xf32>
    %80 = arith.addf %77, %79 : vector<16x64xf32>
    %cst_27 = arith.constant 0.000000e+00 : f32
    %81 = vector.broadcast %cst_27 : f32 to vector<16x64xf32>
    %82 = arith.maximumf %80, %81 : vector<16x64xf32>
    %83 = arith.truncf %82 : vector<16x64xf32> to vector<16x64xbf16>
    %84 = vector.extract_strided_slice %83 {offsets = [0, 0], sizes = [16, 32], strides = [1, 1]} : vector<16x64xbf16> to vector<16x32xbf16>
    %c96 = arith.constant 96 : index
    %c0_28 = arith.constant 0 : index
    %85 = vector.load %arg2[%c96, %c0_28] : memref<128x128xbf16, #tpu.memory_space<vmem>>, vector<32x32xbf16>
    %cst_29 = arith.constant dense<0.000000e+00> : vector<16x32xf32>
    %86 = tpu.matmul %84, %85, %cst_29 {dimension_numbers = #tpu.dot_dimension_numbers<[1], [0], [0], [1], [0, 0, 1, 1], [], []>} : vector<16x32xbf16>, vector<32x32xbf16>, vector<16x32xf32> -> vector<16x32xf32>
    %87 = vector.extract_strided_slice %83 {offsets = [0, 32], sizes = [16, 32], strides = [1, 1]} : vector<16x64xbf16> to vector<16x32xbf16>
    %c96_30 = arith.constant 96 : index
    %c32_31 = arith.constant 32 : index
    %88 = vector.load %arg2[%c96_30, %c32_31] : memref<128x128xbf16, #tpu.memory_space<vmem>>, vector<32x32xbf16>
    %cst_32 = arith.constant dense<0.000000e+00> : vector<16x32xf32>
    %89 = tpu.matmul %87, %88, %cst_32 {dimension_numbers = #tpu.dot_dimension_numbers<[1], [0], [0], [1], [0, 0, 1, 1], [], []>} : vector<16x32xbf16>, vector<32x32xbf16>, vector<16x32xf32> -> vector<16x32xf32>
    %90 = arith.addf %86, %89 : vector<16x32xf32>
    %c3 = arith.constant 3 : index
    %c0_33 = arith.constant 0 : index
    %91 = vector.load %arg3[%c3, %c0_33] : memref<16x128xf32, #tpu.memory_space<vmem>>, vector<1x32xf32>
    %92 = vector.broadcast %91 : vector<1x32xf32> to vector<16x32xf32>
    %93 = arith.addf %90, %92 : vector<16x32xf32>
    %94 = arith.addf %74, %93 : vector<16x32xf32>
    %c6 = arith.constant 6 : index
    %c0_34 = arith.constant 0 : index
    %95 = vector.load %arg3[%c6, %c0_34] : memref<16x128xf32, #tpu.memory_space<vmem>>, vector<1x32xf32>
    %c7 = arith.constant 7 : index
    %c0_35 = arith.constant 0 : index
    %96 = vector.load %arg3[%c7, %c0_35] : memref<16x128xf32, #tpu.memory_space<vmem>>, vector<1x32xf32>
    %cst_36 = arith.constant dense<0.000000e+00> : vector<16xf32>
    %97 = vector.multi_reduction <add>, %94, %cst_36 [1] : vector<16x32xf32> to vector<16xf32>
    %98 = vector.shape_cast %97 : vector<16xf32> to vector<16x1xf32>
    %cst_37 = arith.constant 1.000000e+00 : f32
    %cst_38 = arith.constant 3.200000e+01 : f32
    %99 = arith.divf %cst_37, %cst_38 : f32
    %100 = vector.broadcast %99 : f32 to vector<16x1xf32>
    %101 = arith.mulf %98, %100 : vector<16x1xf32>
    %102 = vector.broadcast %101 : vector<16x1xf32> to vector<16x32xf32>
    %103 = arith.subf %94, %102 : vector<16x32xf32>
    %104 = arith.mulf %103, %103 : vector<16x32xf32>
    %cst_39 = arith.constant dense<0.000000e+00> : vector<16xf32>
    %105 = vector.multi_reduction <add>, %104, %cst_39 [1] : vector<16x32xf32> to vector<16xf32>
    %106 = vector.shape_cast %105 : vector<16xf32> to vector<16x1xf32>
    %cst_40 = arith.constant 3.200000e+01 : f32
    %cst_41 = arith.constant 1.000000e+00 : f32
    %107 = arith.subf %cst_40, %cst_41 : f32
    %cst_42 = arith.constant 1.000000e+00 : f32
    %108 = arith.divf %cst_42, %107 : f32
    %109 = vector.broadcast %108 : f32 to vector<16x1xf32>
    %110 = arith.mulf %106, %109 : vector<16x1xf32>
    %111 = math.sqrt %110 : vector<16x1xf32>
    %cst_43 = arith.constant 9.99999997E-7 : f32
    %112 = vector.broadcast %cst_43 : f32 to vector<16x1xf32>
    %113 = arith.addf %111, %112 : vector<16x1xf32>
    %114 = vector.broadcast %113 : vector<16x1xf32> to vector<16x32xf32>
    %115 = arith.divf %103, %114 : vector<16x32xf32>
    %116 = vector.broadcast %95 : vector<1x32xf32> to vector<16x32xf32>
    %117 = arith.mulf %116, %115 : vector<16x32xf32>
    %118 = vector.broadcast %96 : vector<1x32xf32> to vector<16x32xf32>
    %119 = arith.addf %117, %118 : vector<16x32xf32>
    %c0_44 = arith.constant 0 : index
    %c0_45 = arith.constant 0 : index
    %120 = vector.load %arg4[%c0_44, %c0_45] : memref<16x32xf32, #tpu.memory_space<vmem>>, vector<16x32xf32>
    tpu.vector_store %arg4[%c0_44, %c0_45], %119 {strides = array<i32>} : memref<16x32xf32, #tpu.memory_space<vmem>>, vector<16x32xf32>,
    return
  }
  func.func @transform_0(%arg0: i32) -> (i32, i32) {
    %c0_i32 = arith.constant 0 : i32
    %c0_i32_0 = arith.constant 0 : i32
    %c0_i32_1 = arith.constant 0 : i32
    return %c0_i32, %c0_i32_0 : i32, i32
  }
  func.func @transform_1(%arg0: i32) -> (i32, i32) {
    %c0_i32 = arith.constant 0 : i32
    %c0_i32_0 = arith.constant 0 : i32
    %c0_i32_1 = arith.constant 0 : i32
    return %c0_i32, %c0_i32_0 : i32, i32
  }
  func.func @transform_2(%arg0: i32) -> (i32, i32) {
    %c0_i32 = arith.constant 0 : i32
    %c0_i32_0 = arith.constant 0 : i32
    %c0_i32_1 = arith.constant 0 : i32
    return %c0_i32, %c0_i32_0 : i32, i32
  }
  func.func @transform_3(%arg0: i32) -> (i32, i32) {
    %c0_i32 = arith.constant 0 : i32
    %c0_i32_0 = arith.constant 0 : i32
    %c0_i32_1 = arith.constant 0 : i32
    return %c0_i32, %c0_i32_0 : i32, i32
  }
}

</mosaic_0001>

<bundles_post_ra>
// kernel: self_attn_forward.1
= control target key start
LH: loop header
LB: loop body
LE: loop exit
PB: predicated region body
PF: predicated region fallthrough
CT: control target
= control target key end

     0   :  { %8 = vsyncpa [#allocation3], 0  ;;  %s3932_s0 = inlined_call_operand.hbm [shape: f32[16,32], index: 0, kind: input, shape index: {}]   ;;  %s3933_s1 = inlined_call_operand.hbm [shape: bf16[128,128], index: 1, kind: input, shape index: {}]   ;;  %s3934_s2 = inlined_call_operand.hbm [shape: f32[16,128], index: 2, kind: input, shape index: {}]   ;;  %s3935_s3 = inlined_call_operand.hbm [shape: f32[16,32], index: 3, kind: output, shape index: {}]  }
   0x1   :  { %9 = vsyncpa [#allocation6], 0 }
   0x2   :  { %10 = vsyncpa [#allocation4], 0  ;;  %s3439_s12 = smov [#allocation5]  }
   0x3   :  { %s28_s13 = sshll.u32 %s3439_s12, 4  ;;  %s29_s13 = int_to_ptr.vmem [resolvable:$true] %s28_s13 }
   0x4   :  { %s3361_s14 = scalar_lea.vmem %s29_s13, 1024  ;;  %p3366_p1 = scmp.lt.s32.totalorder %s29_s13, %s29_s13 }
   0x5   :  { %p3362_p0 = scmp.ne.s32.totalorder %s29_s13, %s3361_s14  ;;  %p3367_p2 = scmp.lt.s32.totalorder %s3361_s14, %s3361_s14 }
   0x7   :  { %p3368_p3 = por %p3367_p2, %p3366_p1 }
   0x9   :  { %p3369_p4 = pnand %p3368_p3, %p3362_p0 }
   0xb   :  { %3372 = shalt.err (!%p3369_p4)
}
   0xc   :  { %s3440_s15 = smov 64   ;;  %s3441_s16 = smov 4  }
   0xd   :  { %34 = dma.hbm_to_vmem [thread:$0]  %s3933_s1, 1024, %s29_s13, [#allocation6], %s3440_s15, %s3440_s15, %s3441_s16  }
   0xe   :  { %s3442_s19 = smov [#allocation2]  }
   0xf   :  { %s16_s20 = sshll.u32 %s3442_s19, 4  ;;  %s17_s20 = int_to_ptr.vmem [resolvable:$true] %s16_s20 }
  0x10   :  { %s3381_s21 = scalar_lea.vmem %s17_s20, 256  ;;  %p3386_p6 = scmp.lt.s32.totalorder %s17_s20, %s17_s20 }
  0x11   :  { %p3382_p5 = scmp.ne.s32.totalorder %s17_s20, %s3381_s21  ;;  %p3387_p7 = scmp.lt.s32.totalorder %s3381_s21, %s3381_s21 }
  0x13   :  { %p3388_p8 = por %p3387_p7, %p3386_p6 }
  0x15   :  { %p3389_p9 = pnand %p3388_p8, %p3382_p5 }
  0x17   :  { %3392 = shalt.err (!%p3389_p9)
}
  0x18   :  { %s3443_s22 = smov 128   ;;  %s3444_s23 = smov 8  }
  0x19   :  { %22 = dma.hbm_to_vmem [thread:$0]  %s3932_s0, 256, %s17_s20, [#allocation3], %s3443_s22, %s3443_s22, %s3444_s23  }
  0x1a   :  { %s3445_s1 = smov [#allocation7]  }
  0x1b   :  { %s40_s26 = sshll.u32 %s3445_s1, 4  ;;  %s41_s26 = int_to_ptr.vmem [resolvable:$true] %s40_s26 }
  0x1c   :  { %s3401_s27 = scalar_lea.vmem %s41_s26, 256  ;;  %p3406_p11 = scmp.lt.s32.totalorder %s41_s26, %s41_s26 }
  0x1d   :  { %p3402_p10 = scmp.ne.s32.totalorder %s41_s26, %s3401_s27  ;;  %p3407_p12 = scmp.lt.s32.totalorder %s3401_s27, %s3401_s27 }
  0x1f   :  { %p3408_p13 = por %p3407_p12, %p3406_p11 }
  0x21   :  { %p3409_p0 = pnand %p3408_p13, %p3402_p10 }
  0x23   :  { %3412 = shalt.err (!%p3409_p0)
}
  0x24   :  { %46 = dma.hbm_to_vmem [thread:$0]  %s3934_s2, 256, %s41_s26, [#allocation6], %s3443_s22, %s3443_s22, %s3444_s23  }
  0x25   :  { %3433 = dma.done.wait [#allocation3], 256  }
  0x26   :  { %3434 = vsyncadd [#allocation3], 4294967040 }
  0x27   :  { %3435 = dma.done.wait [#allocation6], 1280  }
  0x28   :  { %3436 = vsyncadd [#allocation6], 4294966016  ;;  %v3446_v0 = vmov 0.0   ;;  %vm3447_vm0 = vmmov 0   ;;  %v3295_v1 = vld [vmem:[#allocation5 + $0x8] sm:$0xff]   ;;  %v3296_v2 = vld [vmem:[#allocation5] sm:$0xff]   ;;  %v151_v21 = vlaneseq }
  0x29   :  { %3141 = vmatprep.subr.bf16.mxu0 %v3446_v0  ;;  %3145 = vmatprep.mubr.msk.bf16.mxu0 %vm3447_vm0, %v3446_v0  ;;  %v57_v3 = vld [vmem:[#allocation2] sm:$0xff]  ;;  %v58_v4 = vld [vmem:[#allocation2 + $0x8] sm:$0xff]  ;;  %vm81_vm1 = vcmask 261120   ;;  %v3032_v6 = vld [vmem:[#allocation7] ss:$0 sm:$0xff]  ;;  %s3448_s0 = smov 104  }
  0x2a   :  { %3149 = vmatprep.subr.mxu1 %v3446_v0  ;;  %3151 = vmatprep.mubr.msk.f32.mxu1 %vm3447_vm0, %v3446_v0  ;;  %v59_v5 = vpack.c.bf16 %v58_v4, %v57_v3  ;;  %s3449_s2 = smov 120   ;;  %s3450_s30 = smov 112   ;;  %v3452_v19 = vmov 1983009808   ;;  %v3539_v23 = vshrl.u32 %v151_v21, 7  ;;  %vm1034_vm2 = vcmask 64512  }
  0x2b   :  { %3142 = vmatpush3.bf16.msra.mxu0 %v3295_v1  ;;  %s3451_s4 = smov 96   ;;  %v149_v20 = vunpack.c.l.s4 %v3452_v19  ;;  %v3453_v24 = vmov 1934713408   ;;  %s3455_s5 = smov 16   ;;  %vm2639_vm3 = vcmask 130048   ;;  %vm2642_vm4 = vcmask 195584  }
  0x2c   :  { %3143 = vmatprep.subr.bf16.mxu0 %v3446_v0  ;;  %v181_v25 = vunpack.c.l.s4 %v3453_v24  ;;  %s3456_s6 = smov 24   ;;  %s3457_s7 = smov [#allocation8]  }
  0x2d   :  { %v150_v22 = vunpack.c.0.s8 %v149_v20  ;;  %s3019_s8 = sshll.u32 %s3457_s7, 4  ;;  %s3020_s8 = int_to_ptr.vmem [resolvable:$true] %s3019_s8 }
  0x2e   :  { %v182_v31 = vunpack.c.0.s8 %v181_v25  ;;  %s3413_s9 = scalar_lea.vmem %s3020_s8, 256  ;;  %p3418_p2 = scmp.lt.s32.totalorder %s3020_s8, %s3020_s8 }
  0x2f   :  { %3144 = vmatpush3.bf16.msra.mxu0 %v3296_v2  ;;  %v3544_v28 = vsub.s32 %v150_v22, %v3539_v23  ;;  %p3414_p1 = scmp.ne.s32.totalorder %s3020_s8, %s3413_s9  ;;  %p3419_p3 = scmp.lt.s32.totalorder %s3413_s9, %s3413_s9 }
  0x30   :  { %3164 = vmatprep.subr.mxu0 %v3446_v0  ;;  %v3555_v36 = vsub.s32 %v182_v31, %v3539_v23 }
  0x31   :  { %p3420_p4 = por %p3419_p3, %p3418_p2 }
  0x32   :  { %3146 = vmatmul.mubr.msk.bf16.vlgmr.msra.gmra.mxu0 %vm81_vm1, %v59_v5 }
  0x33   :  { %3166 = vmatprep.mubr.msk.f32.mxu0 %vm3447_vm0, %v3446_v0  ;;  %p3421_p5 = pnand %p3420_p4, %p3414_p1 }
  0xf2   :  { %v119_v7 = vpop.f32.mrf.mxu0 }
  0xf3   :  { %v120_v8 = vadd.f32 %v3032_v6, %v119_v7 }
  0xf4   :  { %v3147_v9 = vpop.f32.mrf.mxu0 }
  0xf5   :  { %140 = vrot.lane.b32.xlu1 %v120_v8, %s3448_s0  ;;  %128 = vrot.lane.b32.xlu0 %v120_v8, %s3449_s2 }
  0xf6   :  { %v122_v10 = vpop.f32.mrf.mxu0 }
  0xf7   :  { %v3506_v11 = vadd.f32 %v3032_v6, %v122_v10 }
  0xf8   :  { %v3148_v12 = vpop.f32.mrf.mxu0 }
  0xf9   :  { %134 = vrot.lane.b32.xlu0 %v120_v8, %s3450_s30  ;;  %130 = vrot.lane.b32.xlu1 %v3506_v11, %s3449_s2 }
  0xfd   :  { %136 = vrot.lane.b32.xlu0 %v3506_v11, %s3450_s30  ;;  %142 = vrot.lane.b32.xlu1 %v3506_v11, %s3448_s0 }
 0x101   :  { %418 = vrot.lane.b32.xlu0 %v120_v8, %s3451_s4 }
 0x167   :  { %v3512_v13 = vpop.permute.xlu0 %128  ;;  %v3514_v14 = vpop.permute.xlu1 %140 }
 0x168   :  { %422 = vrot.lane.b32.xlu1 %v3512_v13, %s3451_s4  ;;  %v162_v29 = vcombine.low %v3512_v13, %v3514_v14  ;;  %v163_v30 = vcombine.high %v3512_v13, %v3514_v14 }
 0x16a   :  { %v170_v34 = vrot.slane %v162_v29, %v3544_v28  ;;  %v177_v35 = vrot.slane %v163_v30, %v3544_v28 }
 0x16b   :  { %v3518_v15 = vpop.permute.xlu0 %134  ;;  %v3524_v16 = vpop.permute.xlu1 %130 }
 0x16c   :  { %426 = vrot.lane.b32.xlu0 %v3518_v15, %s3451_s4  ;;  %430 = vrot.lane.b32.xlu1 %v3514_v14, %s3451_s4  ;;  %v146_v26 = vcombine.low %v120_v8, %v3518_v15  ;;  %v147_v27 = vcombine.high %v120_v8, %v3518_v15 }
 0x16e   :  { %v154_v32 = vrot.slane %v146_v26, %v3544_v28  ;;  %v161_v33 = vrot.slane %v147_v27, %v3544_v28 }
 0x16f   :  { %v3530_v17 = vpop.permute.xlu0 %136  ;;  %v3532_v18 = vpop.permute.xlu1 %142 }
 0x170   :  { %420 = vrot.lane.b32.xlu0 %v3506_v11, %s3451_s4  ;;  %424 = vrot.lane.b32.xlu1 %v3524_v16, %s3451_s4  ;;  %v178_v37 = vcombine.low %v154_v32, %v170_v34  ;;  %v179_v38 = vcombine.high %v154_v32, %v170_v34  ;;  %v194_v39 = vcombine.low %v161_v33, %v177_v35 }
 0x171   :  { %v195_v40 = vcombine.high %v161_v33, %v177_v35  ;;  %v214_v41 = vcombine.low %v3506_v11, %v3530_v17  ;;  %v230_v42 = vcombine.low %v3524_v16, %v3532_v18  ;;  %v215_v43 = vcombine.high %v3506_v11, %v3530_v17 }
 0x172   :  { %v231_v44 = vcombine.high %v3524_v16, %v3532_v18  ;;  %v186_v45 = vrot.slane %v178_v37, %v3555_v36  ;;  %v193_v46 = vrot.slane %v179_v38, %v3555_v36  ;;  %v202_v47 = vrot.slane %v194_v39, %v3555_v36 }
 0x173   :  { %v209_v48 = vrot.slane %v195_v40, %v3555_v36  ;;  %v222_v49 = vrot.slane %v214_v41, %v3544_v28  ;;  %v238_v50 = vrot.slane %v230_v42, %v3544_v28  ;;  %v229_v51 = vrot.slane %v215_v43, %v3544_v28  ;;  %v419_v61 = vpop.permute.xlu0 %418 }
 0x174   :  { %428 = vrot.lane.b32.xlu0 %v3530_v17, %s3451_s4  ;;  %432 = vrot.lane.b32.xlu1 %v3532_v18, %s3451_s4  ;;  %v245_v52 = vrot.slane %v231_v44, %v3544_v28  ;;  %v282_v53 = vcombine.low %v186_v45, %v193_v46  ;;  %v3036_v54 = vcombine.high %v186_v45, %v193_v46 }
 0x175   :  { %v298_v55 = vcombine.low %v202_v47, %v209_v48  ;;  %v246_v56 = vcombine.low %v222_v49, %v238_v50  ;;  %v3037_v57 = vcombine.high %v202_v47, %v209_v48  ;;  %v247_v58 = vcombine.high %v222_v49, %v238_v50 }
 0x176   :  { %v262_v59 = vcombine.low %v229_v51, %v245_v52  ;;  %v263_v60 = vcombine.high %v229_v51, %v245_v52  ;;  %v289_v63 = vrot.slane %v282_v53, %v3544_v28  ;;  %v297_v1 = vrot.slane %v3036_v54, %v3544_v28 }
 0x177   :  { %v254_v2 = vrot.slane %v246_v56, %v3555_v36  ;;  %v3577_v3 = vrot.slane %v298_v55, %v3544_v28  ;;  %v261_v4 = vrot.slane %v247_v58, %v3555_v36  ;;  %v3587_v9 = vrot.slane %v3037_v57, %v3544_v28 }
 0x178   :  { %714 = vrot.lane.b32.xlu1 %v120_v8, %s3440_s15  ;;  %v3581_v5 = vrot.slane %v262_v59, %v3555_v36  ;;  %v3584_v6 = vrot.slane %v263_v60, %v3555_v36  ;;  %v314_v21 = vcombine.low %v289_v63, %v297_v1  ;;  %v315_v22 = vcombine.high %v289_v63, %v297_v1 }
 0x179   :  { %v350_v29 = vcombine.low %v254_v2, %v261_v4  ;;  %v3038_v30 = vcombine.high %v254_v2, %v261_v4  ;;  %v330_v33 = vcombine.low %v3577_v3, %v3587_v9  ;;  %v331_v42 = vcombine.high %v3577_v3, %v3587_v9 }
 0x17a   :  { %v366_v31 = vcombine.low %v3581_v5, %v3584_v6  ;;  %v3039_v40 = vcombine.high %v3581_v5, %v3584_v6  ;;  %v3600_v41 = vrot.slane %v314_v21, %v3555_v36  ;;  %v3605_v43 = vrot.slane %v315_v22, %v3555_v36 }
 0x17b   :  { %v3612_v48 = vrot.slane %v350_v29, %v3544_v28  ;;  %v3615_v49 = vrot.slane %v3038_v30, %v3544_v28  ;;  %v3621_v52 = vrot.slane %v330_v33, %v3555_v36 }
 0x17c   :  { %v3618_v50 = vrot.slane %v366_v31, %v3544_v28 }
 0x1da   :  { %v423_v62 = vpop.permute.xlu1 %422 }
 0x1de   :  { %v427_v7 = vpop.permute.xlu0 %426  ;;  %v431_v8 = vpop.permute.xlu1 %430 }
 0x1df   :  { %v442_v10 = vcombine.low %v419_v61, %v427_v7  ;;  %v443_v12 = vcombine.high %v419_v61, %v427_v7  ;;  %v458_v19 = vcombine.low %v423_v62, %v431_v8  ;;  %v459_v20 = vcombine.high %v423_v62, %v431_v8 }
 0x1e1   :  { %v450_v24 = vrot.slane %v442_v10, %v3544_v28  ;;  %v457_v25 = vrot.slane %v443_v12, %v3544_v28  ;;  %v466_v26 = vrot.slane %v458_v19, %v3544_v28  ;;  %v473_v27 = vrot.slane %v459_v20, %v3544_v28 }
 0x1e2   :  { %v421_v32 = vpop.permute.xlu0 %420  ;;  %v425_v39 = vpop.permute.xlu1 %424 }
 0x1e3   :  { %v474_v34 = vcombine.low %v450_v24, %v466_v26  ;;  %v475_v35 = vcombine.high %v450_v24, %v466_v26  ;;  %v490_v37 = vcombine.low %v457_v25, %v473_v27  ;;  %v491_v38 = vcombine.high %v457_v25, %v473_v27 }
 0x1e5   :  { %v482_v44 = vrot.slane %v474_v34, %v3555_v36  ;;  %v489_v45 = vrot.slane %v475_v35, %v3555_v36  ;;  %v498_v46 = vrot.slane %v490_v37, %v3555_v36  ;;  %v505_v47 = vrot.slane %v491_v38, %v3555_v36 }
 0x1e6   :  { %v429_v51 = vpop.permute.xlu0 %428  ;;  %v433_v57 = vpop.permute.xlu1 %432  ;;  %v345_v35 = vrot.slane %v331_v42, %v3555_v36 }
 0x1e7   :  { %v578_v53 = vcombine.low %v482_v44, %v489_v45  ;;  %v3040_v54 = vcombine.high %v482_v44, %v489_v45  ;;  %v594_v55 = vcombine.low %v498_v46, %v505_v47  ;;  %v3041_v56 = vcombine.high %v498_v46, %v505_v47 }
 0x1e8   :  { %v510_v58 = vcombine.low %v421_v32, %v429_v51  ;;  %v511_v59 = vcombine.high %v421_v32, %v429_v51  ;;  %v526_v60 = vcombine.low %v425_v39, %v433_v57  ;;  %v527_v61 = vcombine.high %v425_v39, %v433_v57 }
 0x1e9   :  { %v585_v62 = vrot.slane %v578_v53, %v3544_v28  ;;  %v593_v63 = vrot.slane %v3040_v54, %v3544_v28  ;;  %v601_v1 = vrot.slane %v594_v55, %v3544_v28  ;;  %v609_v2 = vrot.slane %v3041_v56, %v3544_v28 }
 0x1ea   :  { %v518_v3 = vrot.slane %v510_v58, %v3544_v28  ;;  %v525_v4 = vrot.slane %v511_v59, %v3544_v28  ;;  %v534_v5 = vrot.slane %v526_v60, %v3544_v28  ;;  %v541_v6 = vrot.slane %v527_v61, %v3544_v28 }
 0x1eb   :  { %v610_v7 = vcombine.low %v585_v62, %v593_v63  ;;  %v611_v8 = vcombine.high %v585_v62, %v593_v63  ;;  %v626_v9 = vcombine.low %v601_v1, %v609_v2  ;;  %v627_v10 = vcombine.high %v601_v1, %v609_v2 }
 0x1ec   :  { %v542_v12 = vcombine.low %v518_v3, %v534_v5  ;;  %v543_v19 = vcombine.high %v518_v3, %v534_v5  ;;  %v558_v20 = vcombine.low %v525_v4, %v541_v6  ;;  %v559_v21 = vcombine.high %v525_v4, %v541_v6 }
 0x1ed   :  { %v618_v22 = vrot.slane %v610_v7, %v3555_v36  ;;  %v634_v24 = vrot.slane %v626_v9, %v3555_v36  ;;  %v625_v25 = vrot.slane %v611_v8, %v3555_v36  ;;  %v641_v26 = vrot.slane %v627_v10, %v3555_v36 }
 0x1ee   :  { %v550_v27 = vrot.slane %v542_v12, %v3555_v36  ;;  %v557_v29 = vrot.slane %v543_v19, %v3555_v36  ;;  %v566_v30 = vrot.slane %v558_v20, %v3555_v36  ;;  %v573_v31 = vrot.slane %v559_v21, %v3555_v36 }
 0x1ef   :  { %v381_v32 = vrot.slane %v3039_v40, %v3544_v28  ;;  %v642_v33 = vcombine.low %v618_v22, %v634_v24  ;;  %v645_v34 = vcombine.high %v625_v25, %v641_v26  ;;  %v346_v45 = vcombine.low %v3600_v41, %v3621_v52 }
 0x1f0   :  { %v646_v37 = vcombine.low %v550_v27, %v557_v29  ;;  %v3042_v38 = vcombine.high %v550_v27, %v557_v29  ;;  %v662_v39 = vcombine.low %v566_v30, %v573_v31  ;;  %v3043_v44 = vcombine.high %v566_v30, %v573_v31 }
 0x1f1   :  { %3150 = vmatpush3.xpose.msk.msra.mxu1 %vm1034_vm2, %v642_v33  ;;  %3165 = vmatpush3.xpose.msk.msra.mxu0 %vm1034_vm2, %v645_v34  ;;  %v643_v42 = vcombine.high %v618_v22, %v634_v24  ;;  %v349_v53 = vcombine.high %v3605_v43, %v345_v35  ;;  %v382_v54 = vcombine.low %v3612_v48, %v3615_v49  ;;  %v3454_v19 = vmov 1966171168   ;;  %v3048_v24 = vld.sshfl [vmem:[#allocation7 + $0x8] sm:$0x11 pattern:$0x75316420] }
 0x1f2   :  { %v653_v46 = vrot.slane %v646_v37, %v3544_v28  ;;  %v661_v47 = vrot.slane %v3042_v38, %v3544_v28  ;;  %v669_v40 = vrot.slane %v662_v39, %v3544_v28  ;;  %v677_v51 = vrot.slane %v3043_v44, %v3544_v28  ;;  %3154 = vmatprep.subr.mxu1 %v3446_v0 }
 0x1f3   :  { %3174 = vmatprep.subr.mxu0 %v3446_v0  ;;  %v398_v55 = vcombine.low %v3618_v50, %v381_v32  ;;  %v383_v60 = vcombine.high %v3612_v48, %v3615_v49  ;;  %v347_v61 = vcombine.high %v3600_v41, %v3621_v52  ;;  %v644_v1 = vcombine.low %v625_v25, %v641_v26 }
 0x1f4   :  { %v678_v56 = vcombine.low %v653_v46, %v661_v47  ;;  %v679_v57 = vcombine.high %v653_v46, %v661_v47  ;;  %v694_v58 = vcombine.low %v669_v40, %v677_v51  ;;  %v695_v59 = vcombine.high %v669_v40, %v677_v51  ;;  %3152 = vmatmul.mubr.msk.f32.vlgmr.msra.gmra.mxu1 %vm1034_vm2, %v346_v45 }
 0x1f5   :  { %3167 = vmatmul.mubr.msk.f32.vlgmr.msra.gmra.mxu0 %vm1034_vm2, %v349_v53  ;;  %3155 = vmatpush3.xpose.msk.msra.mxu1 %vm1034_vm2, %v643_v42  ;;  %v390_v2 = vrot.slane %v382_v54, %v3555_v36  ;;  %v406_v48 = vrot.slane %v398_v55, %v3555_v36  ;;  %v399_v49 = vcombine.high %v3618_v50, %v381_v32  ;;  %v1021_v20 = vunpack.c.l.s4 %v3454_v19 }
 0x1f6   :  { %3156 = vmatprep.mubr.msk.f32.mxu1 %vm3447_vm0, %v3446_v0  ;;  %3159 = vmatprep.subr.mxu1 %v3446_v0  ;;  %v686_v62 = vrot.slane %v678_v56, %v3555_v36  ;;  %v702_v63 = vrot.slane %v694_v58, %v3555_v36  ;;  %v693_v52 = vrot.slane %v679_v57, %v3555_v36  ;;  %v1653_v26 = vsub.s32 0, %v3539_v23 }
 0x1f7   :  { %3176 = vmatprep.mubr.msk.f32.mxu0 %vm3447_vm0, %v3446_v0  ;;  %v709_v3 = vrot.slane %v695_v59, %v3555_v36  ;;  %v348_v4 = vcombine.low %v3605_v43, %v345_v35  ;;  %v415_v5 = vcombine.high %v390_v2, %v406_v48  ;;  %v397_v6 = vrot.slane %v383_v60, %v3555_v36 }
 0x1f8   :  { %3157 = vmatmul.mubr.msk.f32.vlgmr.msra.gmra.mxu1 %vm1034_vm2, %v347_v61  ;;  %v711_v41 = vcombine.high %v686_v62, %v702_v63  ;;  %v710_v50 = vcombine.low %v686_v62, %v702_v63  ;;  %v413_v7 = vrot.slane %v399_v49, %v3555_v36  ;;  %v414_v43 = vcombine.low %v390_v2, %v406_v48 }
 0x1f9   :  { %3160 = vmatpush3.xpose.msk.msra.mxu1 %vm1034_vm2, %v644_v1  ;;  %3161 = vmatprep.mubr.msk.f32.mxu1 %vm3447_vm0, %v3446_v0  ;;  %v713_v8 = vcombine.high %v693_v52, %v709_v3  ;;  %v712_v10 = vcombine.low %v693_v52, %v709_v3  ;;  %v1022_v21 = vunpack.c.0.s8 %v1021_v20  ;;  %v1019_v30 = vcombine.high %v3048_v24, %v3048_v24 }
 0x1fa   :  { %3175 = vmatpush3.xpose.msk.msra.mxu0 %vm1034_vm2, %v711_v41  ;;  %3169 = vmatprep.subr.mxu1 %v3446_v0  ;;  %v417_v9 = vcombine.high %v397_v6, %v413_v7  ;;  %v416_v12 = vcombine.low %v397_v6, %v413_v7 }
 0x1fb   :  { %3184 = vmatprep.subr.mxu0 %v3446_v0  ;;  %v1025_v22 = vsub.s32 %v1022_v21, %v3539_v23 }
 0x1fc   :  { %3162 = vmatmul.mubr.msk.f32.vlgmr.msra.gmra.mxu1 %vm1034_vm2, %v348_v4 }
 0x1fd   :  { %3177 = vmatmul.mubr.msk.f32.vlgmr.msra.gmra.mxu0 %vm1034_vm2, %v415_v5  ;;  %3170 = vmatpush3.xpose.msk.msra.mxu1 %vm1034_vm2, %v710_v50  ;;  %v1026_v25 = vrot.slane %v3048_v24, %v1025_v22  ;;  %v1033_v39 = vrot.slane %v1019_v30, %v1025_v22 }
 0x1fe   :  { %3185 = vmatpush3.xpose.msk.msra.mxu0 %vm1034_vm2, %v713_v8  ;;  %3171 = vmatprep.mubr.msk.f32.mxu1 %vm3447_vm0, %v3446_v0 }
 0x1ff   :  { %3186 = vmatprep.mubr.msk.f32.mxu0 %vm3447_vm0, %v3446_v0  ;;  %3179 = vmatprep.subr.mxu1 %v3446_v0  ;;  %v1654_v27 = vrot.slane %v1026_v25, %v1653_v26  ;;  %v1658_v23 = vrot.slane %v1033_v39, %v1653_v26 }
 0x200   :  { %3172 = vmatmul.mubr.msk.f32.vlgmr.msra.gmra.mxu1 %vm1034_vm2, %v414_v43  ;;  %3194 = vmatprep.subr.mxu0 %v3446_v0 }
 0x201   :  { %3187 = vmatmul.mubr.msk.f32.vlgmr.msra.gmra.mxu0 %vm1034_vm2, %v417_v9  ;;  %3180 = vmatpush3.xpose.msk.msra.mxu1 %vm1034_vm2, %v712_v10 }
 0x202   :  { %3181 = vmatprep.mubr.msk.f32.mxu1 %vm3447_vm0, %v3446_v0  ;;  %3189 = vmatprep.subr.mxu1 %v3446_v0 }
 0x203   :  { %3196 = vmatprep.mubr.msk.f32.mxu0 %vm3447_vm0, %v3446_v0 }
 0x204   :  { %3182 = vmatmul.mubr.msk.f32.vlgmr.msra.gmra.mxu1 %vm1034_vm2, %v416_v12 }
 0x205   :  { %3191 = vmatprep.mubr.msk.f32.mxu1 %vm3447_vm0, %v3446_v0 }
 0x2b4   :  { %v1107_v29 = vpop.f32.mrf.mxu1 }
 0x2b5   :  { %v1643_v31 = vmul.f32 0.35355338, %v1107_v29  ;;  %v1335_v32 = vpop.f32.mrf.mxu0 }
 0x2b6   :  { %v1646_v33 = vmul.f32 0.35355338, %v1335_v32  ;;  %v3153_v34 = vpop.f32.mrf.mxu1 }
 0x2b7   :  { %v3168_v35 = vpop.f32.mrf.mxu0  ;;  %v1661_v37 = vadd.f32 %v1654_v27, %v1643_v31 }
 0x2b8   :  { %v1183_v38 = vpop.f32.mrf.mxu1  ;;  %v1664_v46 = vadd.f32 %v1654_v27, %v1646_v33 }
 0x2b9   :  { %v1644_v44 = vmul.f32 0.35355338, %v1183_v38  ;;  %v1669_v45 = vsel %vm1034_vm2, %v1661_v37, -inf }
 0x2ba   :  { %1670 = vmax.xlane.f32.xlu0 %v1669_v45  ;;  %v3158_v47 = vpop.f32.mrf.mxu1  ;;  %v1678_v54 = vsel %vm1034_vm2, %v1664_v46, -inf }
 0x2bb   :  { %v1662_v40 = vadd.f32 %v1654_v27, %v1644_v44 }
 0x2bc   :  { %v1259_v51 = vpop.f32.mrf.mxu1 }
 0x2bd   :  { %v1487_v42 = vpop.f32.mrf.mxu0  ;;  %v1672_v53 = vsel %vm1034_vm2, %v1662_v40, -inf  ;;  %v1645_v55 = vmul.f32 0.35355338, %v1259_v51 }
 0x2be   :  { %v1648_v56 = vmul.f32 0.35355338, %v1487_v42  ;;  %1673 = vmax.xlane.f32.xlu1 %v1672_v53  ;;  %v3163_v57 = vpop.f32.mrf.mxu1  ;;  %1679 = vmax.xlane.f32.xlu0 %v1678_v54 }
 0x2bf   :  { %v3178_v58 = vpop.f32.mrf.mxu0  ;;  %v1663_v1 = vadd.f32 %v1654_v27, %v1645_v55 }
 0x2c0   :  { %v1411_v59 = vpop.f32.mrf.mxu1  ;;  %v1666_v60 = vadd.f32 %v1658_v23, %v1648_v56 }
 0x2c1   :  { %v1639_v61 = vpop.f32.mrf.mxu0  ;;  %v1675_v41 = vsel %vm1034_vm2, %v1663_v1, -inf  ;;  %v1647_v52 = vmul.f32 0.35355338, %v1411_v59 }
 0x2c2   :  { %v3173_v62 = vpop.f32.mrf.mxu1  ;;  %v1684_v63 = vsel %vm1034_vm2, %v1666_v60, -inf  ;;  %v1650_v5 = vmul.f32 0.35355338, %v1639_v61 }
 0x2c3   :  { %1685 = vmax.xlane.f32.xlu0 %v1684_v63  ;;  %v3188_v2 = vpop.f32.mrf.mxu0  ;;  %v3718_v4 = vadd.f32 %v1658_v23, %v1647_v52 }
 0x2c4   :  { %v1563_v48 = vpop.f32.mrf.mxu1  ;;  %v3724_v7 = vadd.f32 %v1658_v23, %v1650_v5 }
 0x2c5   :  { %v1649_v3 = vmul.f32 0.35355338, %v1563_v48  ;;  %v1681_v50 = vsel %vm1034_vm2, %v3718_v4, -inf }
 0x2c6   :  { %v3183_v49 = vpop.f32.mrf.mxu1 }
 0x2c7   :  { %1676 = vmax.xlane.f32.xlu0 %v1675_v41  ;;  %v3722_v6 = vadd.f32 %v1658_v23, %v1649_v3 }
 0x2cf   :  { %722 = vrot.lane.b32.xlu1 %v3518_v15, %s3440_s15  ;;  %v1687_v15 = vsel %vm1034_vm2, %v3722_v6, -inf }
 0x2d3   :  { %726 = vrot.lane.b32.xlu1 %v3514_v14, %s3440_s15  ;;  %v715_v14 = vpop.permute.xlu1 %714 }
 0x2dd   :  { %718 = vrot.lane.b32.xlu0 %v3512_v13, %s3440_s15  ;;  %v1690_v13 = vsel %vm1034_vm2, %v3724_v7, -inf }
 0x2f7   :  { %1682 = vmax.xlane.f32.xlu1 %v1681_v50 }
 0x2fb   :  { %1688 = vmax.xlane.f32.xlu1 %v1687_v15 }
 0x2fc   :  { %1691 = vmax.xlane.f32.xlu0 %v1690_v13 }
 0x30c   :  { %720 = vrot.lane.b32.xlu1 %v3524_v16, %s3440_s15 }
 0x312   :  { %716 = vrot.lane.b32.xlu0 %v3506_v11, %s3440_s15 }
 0x343   :  { %v1671_v8 = vpop.xlane.xlu0 %1670 }
 0x344   :  { %v1693_v43 = vsub.f32 %v1661_v37, %v1671_v8 }
 0x346   :  { %v1701_v9 = vmul.f32 1.442695, %v1693_v43 }
 0x347   :  { %v1674_v10 = vpop.xlane.xlu1 %1673  ;;  %v1680_v12 = vpop.xlane.xlu0 %1679 }
 0x348   :  { %3303 = vpow2.f32 %v1701_v9  ;;  %v1694_v19 = vsub.f32 %v1662_v40, %v1674_v10  ;;  %v1696_v20 = vsub.f32 %v1664_v46, %v1680_v12 }
 0x34a   :  { %v1707_v21 = vmul.f32 1.442695, %v1696_v20  ;;  %v1703_v22 = vmul.f32 1.442695, %v1694_v19 }
 0x34b   :  { %v723_v26 = vpop.permute.xlu1 %722 }
 0x34c   :  { %v1686_v24 = vpop.xlane.xlu0 %1685  ;;  %3305 = vpow2.f32 %v1707_v21  ;;  %v738_v11 = vcombine.low %v715_v14, %v723_v26  ;;  %v739_v30 = vcombine.high %v715_v14, %v723_v26 }
 0x34d   :  { %v1698_v25 = vsub.f32 %v1666_v60, %v1686_v24  ;;  %3307 = vpow2.f32 %v1703_v22 }
 0x34e   :  { %v746_v39 = vrot.slane %v738_v11, %v3544_v28  ;;  %v753_v44 = vrot.slane %v739_v30, %v3544_v28 }
 0x34f   :  { %v1711_v16 = vmul.f32 1.442695, %v1698_v25  ;;  %v727_v32 = vpop.permute.xlu1 %726 }
 0x350   :  { %v1677_v27 = vpop.xlane.xlu0 %1676 }
 0x351   :  { %v1695_v29 = vsub.f32 %v1663_v1, %v1677_v27  ;;  %3309 = vpow2.f32 %v1711_v16 }
 0x353   :  { %v1705_v31 = vmul.f32 1.442695, %v1695_v29 }
 0x354   :  { %v719_v33 = vpop.permute.xlu0 %718 }
 0x355   :  { %v3734_v34 = vpop.eup %3303  ;;  %3311 = vpow2.f32 %v1705_v31  ;;  %v754_v35 = vcombine.low %v719_v33, %v727_v32  ;;  %v755_v37 = vcombine.high %v719_v33, %v727_v32 }
 0x356   :  { %v1717_v38 = vsel %vm1034_vm2, %v3734_v34, 0.0 }
 0x357   :  { %v762_v45 = vrot.slane %v754_v35, %v3544_v28  ;;  %v769_v46 = vrot.slane %v755_v37, %v3544_v28  ;;  %1718 = vadd.xlane.f32.xlu1 %v1717_v38 }
 0x359   :  { %v770_v47 = vcombine.low %v746_v39, %v762_v45  ;;  %v771_v40 = vcombine.high %v746_v39, %v762_v45  ;;  %v786_v51 = vcombine.low %v753_v44, %v769_v46  ;;  %v787_v23 = vcombine.high %v753_v44, %v769_v46  ;;  %v3742_v42 = vpop.eup %3305 }
 0x35a   :  { %v1726_v57 = vsel %vm1034_vm2, %v3742_v42, 0.0  ;;  %v3750_v58 = vpop.eup %3307 }
 0x35b   :  { %v778_v53 = vrot.slane %v770_v47, %v3555_v36  ;;  %v785_v54 = vrot.slane %v771_v40, %v3555_v36  ;;  %v794_v55 = vrot.slane %v786_v51, %v3555_v36  ;;  %v801_v56 = vrot.slane %v787_v23, %v3555_v36  ;;  %1727 = vadd.xlane.f32.xlu0 %v1726_v57 }
 0x35c   :  { %v1720_v49 = vsel %vm1034_vm2, %v3750_v58, 0.0 }
 0x35d   :  { %v874_v59 = vcombine.low %v778_v53, %v785_v54  ;;  %v3044_v60 = vcombine.high %v778_v53, %v785_v54  ;;  %v890_v61 = vcombine.low %v794_v55, %v801_v56  ;;  %v3045_v62 = vcombine.high %v794_v55, %v801_v56 }
 0x35e   :  { %v3758_v41 = vpop.eup %3309 }
 0x35f   :  { %v881_v63 = vrot.slane %v874_v59, %v3544_v28  ;;  %v889_v1 = vrot.slane %v3044_v60, %v3544_v28  ;;  %v897_v2 = vrot.slane %v890_v61, %v3544_v28  ;;  %v905_v48 = vrot.slane %v3045_v62, %v3544_v28  ;;  %1721 = vadd.xlane.f32.xlu0 %v1720_v49 }
 0x360   :  { %v1732_v9 = vsel %vm1034_vm2, %v3758_v41, 0.0 }
 0x361   :  { %v906_v52 = vcombine.low %v881_v63, %v889_v1  ;;  %v922_v3 = vcombine.low %v897_v2, %v905_v48  ;;  %v907_v5 = vcombine.high %v881_v63, %v889_v1  ;;  %v923_v50 = vcombine.high %v897_v2, %v905_v48 }
 0x362   :  { %v3760_v15 = vpop.eup %3311 }
 0x363   :  { %v1723_v13 = vsel %vm1034_vm2, %v3760_v15, 0.0  ;;  %v914_v14 = vrot.slane %v906_v52, %v3555_v36  ;;  %v930_v8 = vrot.slane %v922_v3, %v3555_v36  ;;  %v921_v43 = vrot.slane %v907_v5, %v3555_v36  ;;  %1733 = vadd.xlane.f32.xlu0 %v1732_v9 }
 0x364   :  { %1724 = vadd.xlane.f32.xlu1 %v1723_v13  ;;  %v937_v10 = vrot.slane %v923_v50, %v3555_v36 }
 0x365   :  { %v938_v12 = vcombine.low %v914_v14, %v930_v8  ;;  %v939_v19 = vcombine.high %v914_v14, %v930_v8 }
 0x366   :  { %v940_v20 = vcombine.low %v921_v43, %v937_v10  ;;  %v941_v21 = vcombine.high %v921_v43, %v937_v10 }
 0x367   :  { %3190 = vmatpush3.msra.mxu1 %v938_v12  ;;  %3195 = vmatpush3.msra.mxu0 %v939_v19 }
 0x368   :  { %3199 = vmatprep.subr.mxu1 %v3446_v0  ;;  %3204 = vmatprep.subr.mxu0 %v3446_v0 }
 0x380   :  { %v1683_v22 = vpop.xlane.xlu1 %1682 }
 0x381   :  { %v1697_v24 = vsub.f32 %v3718_v4, %v1683_v22 }
 0x383   :  { %v1709_v11 = vmul.f32 1.442695, %v1697_v24 }
 0x384   :  { %v1689_v25 = vpop.xlane.xlu1 %1688 }
 0x385   :  { %v1699_v26 = vsub.f32 %v3722_v6, %v1689_v25  ;;  %v1692_v16 = vpop.xlane.xlu0 %1691 }
 0x386   :  { %v1700_v27 = vsub.f32 %v3724_v7, %v1692_v16 }
 0x387   :  { %v1713_v29 = vmul.f32 1.442695, %v1699_v26 }
 0x388   :  { %v1715_v30 = vmul.f32 1.442695, %v1700_v27  ;;  %v721_v35 = vpop.permute.xlu1 %720 }
 0x389   :  { %3313 = vpow2.f32 %v1713_v29  ;;  %v717_v38 = vpop.permute.xlu0 %716 }
 0x38a   :  { %3315 = vpow2.f32 %v1715_v30 }
 0x38b   :  { %3317 = vpow2.f32 %v1709_v11 }
 0x396   :  { %v3775_v31 = vpop.eup %3313 }
 0x397   :  { %v3777_v32 = vpop.eup %3315  ;;  %v1735_v33 = vsel %vm1034_vm2, %v3775_v31, 0.0 }
 0x398   :  { %1736 = vadd.xlane.f32.xlu0 %v1735_v33  ;;  %v1738_v4 = vsel %vm1034_vm2, %v3777_v32, 0.0  ;;  %v3783_v6 = vpop.eup %3317 }
 0x399   :  { %1739 = vadd.xlane.f32.xlu1 %v1738_v4  ;;  %v1729_v7 = vsel %vm1034_vm2, %v3783_v6, 0.0 }
 0x39d   :  { %1730 = vadd.xlane.f32.xlu1 %v1729_v7 }
 0x3ae   :  { %728 = vrot.lane.b32.xlu1 %v3532_v18, %s3440_s15  ;;  %724 = vrot.lane.b32.xlu0 %v3530_v17, %s3440_s15 }
 0x3e0   :  { %v1719_v37 = vpop.xlane.xlu1 %1718 }
 0x3e1   :  { %3319 = vrcp.f32 %v1719_v37 }
 0x3e4   :  { %v1728_v39 = vpop.xlane.xlu0 %1727 }
 0x3e8   :  { %v1722_v44 = vpop.xlane.xlu0 %1721 }
 0x3e9   :  { %3321 = vrcp.f32 %v1722_v44 }
 0x3ea   :  { %3323 = vrcp.f32 %v1728_v39 }
 0x3ec   :  { %v1734_v53 = vpop.xlane.xlu0 %1733 }
 0x3ed   :  { %v1725_v45 = vpop.xlane.xlu1 %1724 }
 0x3ee   :  { %v3320_v46 = vpop.eup %3319  ;;  %3325 = vrcp.f32 %v1725_v45 }
 0x3ef   :  { %v1749_v47 = vmul.f32 %v3320_v46, %v3734_v34  ;;  %3327 = vrcp.f32 %v1734_v53 }
 0x3f1   :  { %3192 = vmatmul.mubr.msk.f32.vlgmr.msra.gmra.mxu1 %vm1034_vm2, %v1749_v47 }
 0x3f2   :  { %3200 = vmatpush3.msra.mxu1 %v940_v20  ;;  %3201 = vmatprep.mubr.msk.f32.mxu1 %vm3447_vm0, %v3446_v0 }
 0x3f3   :  { %3209 = vmatprep.subr.mxu1 %v3446_v0 }
 0x3f6   :  { %v3322_v17 = vpop.eup %3321 }
 0x3f7   :  { %v1750_v18 = vmul.f32 %v3322_v17, %v3750_v58  ;;  %v3324_v40 = vpop.eup %3323 }
 0x3f8   :  { %v1752_v23 = vmul.f32 %v3324_v40, %v3742_v42 }
 0x3f9   :  { %3197 = vmatmul.mubr.msk.f32.vlgmr.msra.gmra.mxu0 %vm1034_vm2, %v1750_v18 }
 0x3fa   :  { %3205 = vmatpush3.msra.mxu0 %v941_v21  ;;  %3206 = vmatprep.mubr.msk.f32.mxu0 %vm3447_vm0, %v3446_v0 }
 0x3fb   :  { %v3326_v51 = vpop.eup %3325  ;;  %3214 = vmatprep.subr.mxu0 %v3446_v0 }
 0x3fc   :  { %v1751_v34 = vmul.f32 %v3326_v51, %v3760_v15  ;;  %v3328_v26 = vpop.eup %3327 }
 0x3fd   :  { %3207 = vmatmul.mubr.msk.f32.vlgmr.msra.gmra.mxu0 %vm1034_vm2, %v1752_v23  ;;  %v1754_v37 = vmul.f32 %v3328_v26, %v3758_v41 }
 0x3fe   :  { %3202 = vmatmul.mubr.msk.f32.vlgmr.msra.gmra.mxu1 %vm1034_vm2, %v1751_v34  ;;  %3216 = vmatprep.mubr.msk.f32.mxu0 %vm3447_vm0, %v3446_v0 }
 0x3ff   :  { %3211 = vmatprep.mubr.msk.f32.mxu1 %vm3447_vm0, %v3446_v0 }
 0x421   :  { %v1737_v54 = vpop.xlane.xlu0 %1736 }
 0x422   :  { %v1740_v55 = vpop.xlane.xlu1 %1739 }
 0x425   :  { %v725_v57 = vpop.permute.xlu0 %724 }
 0x426   :  { %v1731_v56 = vpop.xlane.xlu1 %1730  ;;  %v806_v58 = vcombine.low %v717_v38, %v725_v57  ;;  %v807_v59 = vcombine.high %v717_v38, %v725_v57 }
 0x427   :  { %3329 = vrcp.f32 %v1731_v56 }
 0x428   :  { %v814_v62 = vrot.slane %v806_v58, %v3544_v28  ;;  %v821_v63 = vrot.slane %v807_v59, %v3544_v28  ;;  %3331 = vrcp.f32 %v1737_v54 }
 0x429   :  { %3333 = vrcp.f32 %v1740_v55 }
 0x42a   :  { %v729_v42 = vpop.permute.xlu1 %728 }
 0x42b   :  { %v822_v60 = vcombine.low %v721_v35, %v729_v42  ;;  %v823_v61 = vcombine.high %v721_v35, %v729_v42 }
 0x42d   :  { %v830_v1 = vrot.slane %v822_v60, %v3544_v28  ;;  %v837_v2 = vrot.slane %v823_v61, %v3544_v28 }
 0x42f   :  { %v838_v48 = vcombine.low %v814_v62, %v830_v1  ;;  %v839_v49 = vcombine.high %v814_v62, %v830_v1  ;;  %v854_v52 = vcombine.low %v821_v63, %v837_v2  ;;  %v855_v3 = vcombine.high %v821_v63, %v837_v2 }
 0x431   :  { %v846_v5 = vrot.slane %v838_v48, %v3555_v36  ;;  %v853_v50 = vrot.slane %v839_v49, %v3555_v36  ;;  %v862_v15 = vrot.slane %v854_v52, %v3555_v36  ;;  %v869_v13 = vrot.slane %v855_v3, %v3555_v36 }
 0x433   :  { %v942_v14 = vcombine.low %v846_v5, %v853_v50  ;;  %v3046_v8 = vcombine.high %v846_v5, %v853_v50  ;;  %v958_v43 = vcombine.low %v862_v15, %v869_v13  ;;  %v3047_v9 = vcombine.high %v862_v15, %v869_v13 }
 0x434   :  { %v3330_v16 = vpop.eup %3329 }
 0x435   :  { %v949_v10 = vrot.slane %v942_v14, %v3544_v28  ;;  %v957_v12 = vrot.slane %v3046_v8, %v3544_v28  ;;  %v965_v19 = vrot.slane %v958_v43, %v3544_v28  ;;  %v973_v20 = vrot.slane %v3047_v9, %v3544_v28  ;;  %v3332_v33 = vpop.eup %3331 }
 0x436   :  { %v1753_v35 = vmul.f32 %v3330_v16, %v3783_v6  ;;  %v3334_v38 = vpop.eup %3333  ;;  %v1755_v45 = vmul.f32 %v3332_v33, %v3775_v31 }
 0x437   :  { %v974_v21 = vcombine.low %v949_v10, %v957_v12  ;;  %v990_v22 = vcombine.low %v965_v19, %v973_v20  ;;  %v975_v24 = vcombine.high %v949_v10, %v957_v12  ;;  %v991_v25 = vcombine.high %v965_v19, %v973_v20 }
 0x438   :  { %v1756_v6 = vmul.f32 %v3334_v38, %v3777_v32 }
 0x439   :  { %v982_v27 = vrot.slane %v974_v21, %v3555_v36  ;;  %v998_v29 = vrot.slane %v990_v22, %v3555_v36  ;;  %v989_v11 = vrot.slane %v975_v24, %v3555_v36  ;;  %v1005_v30 = vrot.slane %v991_v25, %v3555_v36 }
 0x43b   :  { %v1006_v4 = vcombine.low %v982_v27, %v998_v29  ;;  %v1007_v7 = vcombine.high %v982_v27, %v998_v29  ;;  %v1008_v39 = vcombine.low %v989_v11, %v1005_v30  ;;  %v1009_v44 = vcombine.high %v989_v11, %v1005_v30 }
 0x43d   :  { %3210 = vmatpush3.msra.mxu1 %v1006_v4  ;;  %3215 = vmatpush3.msra.mxu0 %v1007_v7 }
 0x43e   :  { %3212 = vmatmul.mubr.msk.f32.vlgmr.msra.gmra.mxu1 %vm1034_vm2, %v1753_v35  ;;  %3217 = vmatmul.mubr.msk.f32.vlgmr.msra.gmra.mxu0 %vm1034_vm2, %v1754_v37 }
 0x43f   :  { %3219 = vmatprep.subr.mxu1 %v3446_v0  ;;  %3224 = vmatprep.subr.mxu0 %v3446_v0 }
 0x440   :  { %3220 = vmatpush3.msra.mxu1 %v1008_v39  ;;  %3225 = vmatpush3.msra.mxu0 %v1009_v44 }
 0x441   :  { %3221 = vmatprep.mubr.msk.f32.mxu1 %vm3447_vm0, %v3446_v0  ;;  %3226 = vmatprep.mubr.msk.f32.mxu0 %vm3447_vm0, %v3446_v0 }
 0x442   :  { %3222 = vmatmul.mubr.msk.f32.vlgmr.msra.gmra.mxu1 %vm1034_vm2, %v1755_v45  ;;  %3227 = vmatmul.mubr.msk.f32.vlgmr.msra.gmra.mxu0 %vm1034_vm2, %v1756_v6 }
 0x443   :  { %3229 = vmatprep.subr.bf16.mxu1 %v3446_v0  ;;  %3233 = vmatprep.mubr.msk.bf16.mxu1 %vm3447_vm0, %v3446_v0 }
 0x444   :  { %3237 = vmatprep.subr.bf16.mxu0 %v3446_v0  ;;  %3241 = vmatprep.mubr.msk.bf16.mxu0 %vm3447_vm0, %v3446_v0 }
 0x4b1   :  { %v1826_v41 = vpop.f32.mrf.mxu1 }
 0x4b3   :  { %v3193_v31 = vpop.f32.mrf.mxu1 }
 0x4b9   :  { %v1899_v32 = vpop.f32.mrf.mxu0 }
 0x4bb   :  { %v3198_v46 = vpop.f32.mrf.mxu0 }
 0x4bd   :  { %v2045_v40 = vpop.f32.mrf.mxu0 }
 0x4be   :  { %v1972_v47 = vpop.f32.mrf.mxu1  ;;  %v2357_v51 = vcombine.low %v1899_v32, %v2045_v40  ;;  %v2358_v34 = vcombine.high %v1899_v32, %v2045_v40 }
 0x4bf   :  { %v2341_v17 = vcombine.low %v1826_v41, %v1972_v47  ;;  %v2342_v18 = vcombine.high %v1826_v41, %v1972_v47  ;;  %v3208_v55 = vpop.f32.mrf.mxu0 }
 0x4c0   :  { %v3203_v23 = vpop.f32.mrf.mxu1  ;;  %v2365_v56 = vrot.slane %v2357_v51, %v3544_v28  ;;  %v2372_v57 = vrot.slane %v2358_v34, %v3544_v28 }
 0x4c1   :  { %v2349_v53 = vrot.slane %v2341_v17, %v3544_v28  ;;  %v2356_v54 = vrot.slane %v2342_v18, %v3544_v28 }
 0x4c3   :  { %v2373_v58 = vcombine.low %v2349_v53, %v2365_v56  ;;  %v2374_v59 = vcombine.high %v2349_v53, %v2365_v56  ;;  %v2389_v42 = vcombine.low %v2356_v54, %v2372_v57  ;;  %v2390_v60 = vcombine.high %v2356_v54, %v2372_v57  ;;  %v3297_v53 = vld [vmem:[#allocation5 + $0x18] sm:$0xff]  }
 0x4c4   :  { %3230 = vmatpush3.bf16.msra.mxu1 %v3297_v53 }
 0x4c5   :  { %v2381_v61 = vrot.slane %v2373_v58, %v3555_v36  ;;  %v2388_v62 = vrot.slane %v2374_v59, %v3555_v36  ;;  %v2397_v63 = vrot.slane %v2389_v42, %v3555_v36  ;;  %v2404_v1 = vrot.slane %v2390_v60, %v3555_v36  ;;  %3231 = vmatprep.subr.bf16.mxu1 %v3446_v0 }
 0x4c7   :  { %v2477_v2 = vcombine.low %v2381_v61, %v2388_v62  ;;  %v3073_v48 = vcombine.high %v2381_v61, %v2388_v62  ;;  %v2493_v49 = vcombine.low %v2397_v63, %v2404_v1  ;;  %v3074_v52 = vcombine.high %v2397_v63, %v2404_v1  ;;  %v3298_v61 = vld [vmem:[#allocation5 + $0x10] sm:$0xff]  }
 0x4c8   :  { %3232 = vmatpush3.bf16.msra.mxu1 %v3298_v61 }
 0x4c9   :  { %v2484_v3 = vrot.slane %v2477_v2, %v3544_v28  ;;  %v2492_v5 = vrot.slane %v3073_v48, %v3544_v28  ;;  %v2500_v50 = vrot.slane %v2493_v49, %v3544_v28  ;;  %v2508_v15 = vrot.slane %v3074_v52, %v3544_v28  ;;  %3245 = vmatprep.subr.bf16.mxu1 %v3446_v0 }
 0x4cb   :  { %v2510_v13 = vcombine.high %v2484_v3, %v2492_v5  ;;  %v2526_v14 = vcombine.high %v2500_v50, %v2508_v15  ;;  %v2509_v8 = vcombine.low %v2484_v3, %v2492_v5  ;;  %v2525_v43 = vcombine.low %v2500_v50, %v2508_v15 }
 0x4cd   :  { %v3858_v9 = vrot.slane %v2510_v13, %v3555_v36  ;;  %v3861_v10 = vrot.slane %v2526_v14, %v3555_v36  ;;  %v3864_v12 = vrot.slane %v2509_v8, %v3555_v36  ;;  %v3867_v19 = vrot.slane %v2525_v43, %v3555_v36 }
 0x4cf   :  { %v2543_v20 = vcombine.low %v3858_v9, %v3861_v10  ;;  %v2541_v21 = vcombine.low %v3864_v12, %v3867_v19  ;;  %v2542_v22 = vcombine.high %v3864_v12, %v3867_v19  ;;  %v2544_v24 = vcombine.high %v3858_v9, %v3861_v10  ;;  %v3077_v12 = vld [vmem:[#allocation7 + $0x1] ss:$0 sm:$0xff] }
 0x4fe   :  { %v2118_v25 = vpop.f32.mrf.mxu1  ;;  %v2191_v26 = vpop.f32.mrf.mxu0 }
 0x500   :  { %v3213_v16 = vpop.f32.mrf.mxu1  ;;  %v3218_v27 = vpop.f32.mrf.mxu0 }
 0x502   :  { %v2264_v29 = vpop.f32.mrf.mxu1  ;;  %v2337_v11 = vpop.f32.mrf.mxu0 }
 0x503   :  { %v2409_v30 = vcombine.low %v2118_v25, %v2264_v29  ;;  %v2410_v33 = vcombine.high %v2118_v25, %v2264_v29  ;;  %v2425_v4 = vcombine.low %v2191_v26, %v2337_v11  ;;  %v2426_v7 = vcombine.high %v2191_v26, %v2337_v11 }
 0x504   :  { %v3223_v35 = vpop.f32.mrf.mxu1  ;;  %v3228_v37 = vpop.f32.mrf.mxu0 }
 0x505   :  { %v2417_v38 = vrot.slane %v2409_v30, %v3544_v28  ;;  %v2424_v39 = vrot.slane %v2410_v33, %v3544_v28  ;;  %v2433_v44 = vrot.slane %v2425_v4, %v3544_v28  ;;  %v2440_v45 = vrot.slane %v2426_v7, %v3544_v28  ;;  %v3351_v30 = vld [vmem:[#allocation2] sm:$0xff] }
 0x507   :  { %v2441_v6 = vcombine.low %v2417_v38, %v2433_v44  ;;  %v2442_v41 = vcombine.high %v2417_v38, %v2433_v44  ;;  %v2457_v31 = vcombine.low %v2424_v39, %v2440_v45  ;;  %v2458_v32 = vcombine.high %v2424_v39, %v2440_v45  ;;  %v3352_v38 = vld [vmem:[#allocation2 + $0x8] sm:$0xff] }
 0x509   :  { %v2449_v46 = vrot.slane %v2441_v6, %v3555_v36  ;;  %v2456_v47 = vrot.slane %v2442_v41, %v3555_v36  ;;  %v2465_v17 = vrot.slane %v2457_v31, %v3555_v36  ;;  %v2472_v18 = vrot.slane %v2458_v32, %v3555_v36 }
 0x50b   :  { %v2545_v40 = vcombine.low %v2449_v46, %v2456_v47  ;;  %v3075_v51 = vcombine.high %v2449_v46, %v2456_v47  ;;  %v2561_v34 = vcombine.low %v2465_v17, %v2472_v18  ;;  %v3076_v23 = vcombine.high %v2465_v17, %v2472_v18 }
 0x50d   :  { %v2552_v54 = vrot.slane %v2545_v40, %v3544_v28  ;;  %v2560_v55 = vrot.slane %v3075_v51, %v3544_v28  ;;  %v2568_v56 = vrot.slane %v2561_v34, %v3544_v28  ;;  %v2576_v57 = vrot.slane %v3076_v23, %v3544_v28  ;;  %v3299_v51 = vld [vmem:[#allocation5 + $0x28] sm:$0xff]   ;;  %v3300_v34 = vld [vmem:[#allocation5 + $0x20] sm:$0xff]  }
 0x50e   :  { %3238 = vmatpush3.bf16.msra.mxu0 %v3299_v51 }
 0x50f   :  { %v2578_v58 = vcombine.high %v2552_v54, %v2560_v55  ;;  %v2594_v59 = vcombine.high %v2568_v56, %v2576_v57  ;;  %v2577_v42 = vcombine.low %v2552_v54, %v2560_v55  ;;  %v2593_v60 = vcombine.low %v2568_v56, %v2576_v57  ;;  %3239 = vmatprep.subr.bf16.mxu0 %v3446_v0 }
 0x511   :  { %v2592_v62 = vrot.slane %v2578_v58, %v3555_v36  ;;  %v2608_v63 = vrot.slane %v2594_v59, %v3555_v36  ;;  %v2585_v1 = vrot.slane %v2577_v42, %v3555_v36  ;;  %v2601_v2 = vrot.slane %v2593_v60, %v3555_v36 }
 0x512   :  { %3240 = vmatpush3.bf16.msra.mxu0 %v3300_v34 }
 0x513   :  { %v2611_v48 = vcombine.low %v2592_v62, %v2608_v63  ;;  %v2610_v49 = vcombine.high %v2585_v1, %v2601_v2  ;;  %v2609_v28 = vcombine.low %v2585_v1, %v2601_v2  ;;  %v2612_v5 = vcombine.high %v2592_v62, %v2608_v63  ;;  %3253 = vmatprep.subr.bf16.mxu0 %v3446_v0 }
 0x515   :  { %v3285_v52 = vpack.i.bf16 %v2611_v48, %v2543_v20  ;;  %v3280_v3 = vpack.i.bf16 %v2610_v49, %v2542_v22  ;;  %v3290_v50 = vpack.i.bf16 %v2612_v5, %v2544_v24 }
 0x517   :  { %3286 = vrot.lane.b32.xlu1 %v3285_v52, %s3455_s5  ;;  %3281 = vrot.lane.b32.xlu0 %v3280_v3, %s3444_s23  ;;  %v3081_v52 = vld [vmem:[#allocation7 + $0x4] ss:$0 sm:$0xff] }
 0x51b   :  { %3291 = vrot.lane.b32.xlu0 %v3290_v50, %s3456_s6 }
 0x589   :  { %v3287_v15 = vpop.permute.xlu1 %3286  ;;  %v3282_v13 = vpop.permute.xlu0 %3281 }
 0x58a   :  { %v3284_v14 = vunpack.i.h.bf16 %v3282_v13  ;;  %v3283_v36 = vunpack.i.l.bf16 %v3282_v13  ;;  %v3289_v8 = vunpack.i.h.bf16 %v3287_v15  ;;  %v3288_v43 = vunpack.i.l.bf16 %v3287_v15  ;;  %v3082_v15 = vld [vmem:[#allocation7 + $0x5] ss:$0 sm:$0xff] }
 0x58c   :  { %v2637_v9 = vsel %vm1034_vm2, %v2541_v21, %v3283_v36  ;;  %v2638_v10 = vsel %vm1034_vm2, %v2609_v28, %v3284_v14 }
 0x58d   :  { %v3292_v20 = vpop.permute.xlu0 %3291  ;;  %v2640_v25 = vsel %vm2639_vm3, %v2637_v9, %v3288_v43  ;;  %v2641_v26 = vsel %vm2639_vm3, %v2638_v10, %v3289_v8  ;;  %v3301_v43 = vld [vmem:[#allocation5 + $0x38] sm:$0xff]   ;;  %v3302_v9 = vld [vmem:[#allocation5 + $0x30] sm:$0xff]  }
 0x58e   :  { %v3294_v22 = vunpack.i.h.bf16 %v3292_v20  ;;  %v3293_v24 = vunpack.i.l.bf16 %v3292_v20 }
 0x590   :  { %v2643_v16 = vsel %vm2642_vm4, %v2640_v25, %v3293_v24  ;;  %v2644_v27 = vsel %vm2642_vm4, %v2641_v26, %v3294_v22  ;;  %v3083_v22 = vld [vmem:[#allocation7 + $0x2] ss:$0 sm:$0xff] }
 0x591   :  { %v2645_v29 = vpack.c.bf16 %v2644_v27, %v2643_v16 }
 0x593   :  { %3234 = vmatmul.mubr.msk.bf16.vlgmr.msra.gmra.mxu1 %vm81_vm1, %v2645_v29 }
 0x594   :  { %3249 = vmatprep.mubr.msk.bf16.mxu1 %vm3447_vm0, %v3446_v0 }
 0x653   :  { %v2704_v19 = vpop.f32.mrf.mxu1 }
 0x654   :  { %v2705_v21 = vadd.f32 %v3077_v12, %v2704_v19 }
 0x655   :  { %v3235_v11 = vpop.f32.mrf.mxu1 }
 0x656   :  { %v2711_v33 = vadd.f32 %v3351_v30, %v2705_v21 }
 0x657   :  { %v2707_v4 = vpop.f32.mrf.mxu1 }
 0x658   :  { %v2708_v7 = vadd.f32 %v3077_v12, %v2707_v4  ;;  %v2715_v35 = vsel %vm81_vm1, %v2711_v33, 0.0 }
 0x659   :  { %2716 = vadd.xlane.f32.xlu1 %v2715_v35  ;;  %v3236_v37 = vpop.f32.mrf.mxu1  ;;  %v3091_v35 = vld [vmem:[#allocation7 + $0x3] ss:$0 sm:$0xff] }
 0x65a   :  { %v2712_v39 = vadd.f32 %v3352_v38, %v2708_v7 }
 0x65c   :  { %v2718_v44 = vsel %vm81_vm1, %v2712_v39, 0.0 }
 0x65d   :  { %2719 = vadd.xlane.f32.xlu0 %v2718_v44 }
 0x6e2   :  { %v2717_v45 = vpop.xlane.xlu1 %2716 }
 0x6e3   :  { %v2721_v6 = vmul.f32 0.03125, %v2717_v45 }
 0x6e5   :  { %v2723_v41 = vsub.f32 %v2711_v33, %v2721_v6 }
 0x6e6   :  { %v2720_v31 = vpop.xlane.xlu0 %2719 }
 0x6e7   :  { %v2722_v32 = vmul.f32 0.03125, %v2720_v31  ;;  %v2725_v46 = vmul.f32 %v2723_v41, %v2723_v41 }
 0x6e9   :  { %v2724_v47 = vsub.f32 %v2712_v39, %v2722_v32  ;;  %v2727_v17 = vsel %vm81_vm1, %v2725_v46, 0.0 }
 0x6ea   :  { %2728 = vadd.xlane.f32.xlu0 %v2727_v17 }
 0x6eb   :  { %v2726_v18 = vmul.f32 %v2724_v47, %v2724_v47 }
 0x6ed   :  { %v2730_v40 = vsel %vm81_vm1, %v2726_v18, 0.0 }
 0x6ee   :  { %2731 = vadd.xlane.f32.xlu1 %v2730_v40 }
 0x6ff   :  { %2853 = vrot.lane.b32.xlu1 %v3302_v9, %s3451_s4 }
 0x700   :  { %2855 = vrot.lane.b32.xlu0 %v3301_v43, %s3451_s4 }
 0x773   :  { %v2729_v23 = vpop.xlane.xlu0 %2728 }
 0x774   :  { %v2733_v53 = vmul.f32 0.032258064, %v2729_v23 }
 0x776   :  { %3335 = vrsqrt.f32 %v2733_v53  ;;  %vm2737_vm5 = vcmp.eq.f32.partialorder %v2733_v53, inf  ;;  %v2740_v58 = vand.u32 2147483648, %v2733_v53  ;;  %vm2739_vm6 = vcmp.eq.f32.partialorder %v2733_v53, 0.0 }
 0x777   :  { %v2732_v54 = vpop.xlane.xlu1 %2731  ;;  %v2856_v10 = vpop.permute.xlu0 %2855 }
 0x778   :  { %v2734_v55 = vmul.f32 0.032258064, %v2732_v54  ;;  %3246 = vmatpush3.bf16.msra.mxu1 %v2856_v10 }
 0x779   :  { %3247 = vmatprep.subr.bf16.mxu1 %v3446_v0 }
 0x77a   :  { %3337 = vrsqrt.f32 %v2734_v55  ;;  %vm2744_vm7 = vcmp.eq.f32.partialorder %v2734_v55, inf  ;;  %v2747_v63 = vand.u32 2147483648, %v2734_v55  ;;  %vm2746_vm8 = vcmp.eq.f32.partialorder %v2734_v55, 0.0 }
 0x77b   :  { %v2854_v20 = vpop.permute.xlu1 %2853 }
 0x77c   :  { %3248 = vmatpush3.bf16.msra.mxu1 %v2854_v20 }
 0x783   :  { %v3336_v56 = vpop.eup %3335 }
 0x784   :  { %v2736_v57 = vmul.f32 %v3336_v56, %v2733_v53 }
 0x786   :  { %v2738_v59 = vsel %vm2737_vm5, %v2733_v53, %v2736_v57 }
 0x787   :  { %v3338_v42 = vpop.eup %3337  ;;  %v2741_v60 = vsel %vm2739_vm6, %v2740_v58, %v2738_v59 }
 0x788   :  { %v2749_v61 = vadd.f32 1e-06, %v2741_v60  ;;  %v2743_v62 = vmul.f32 %v3338_v42, %v2734_v55 }
 0x78a   :  { %3339 = vrcp.f32 %v2749_v61  ;;  %v2745_v1 = vsel %vm2744_vm7, %v2734_v55, %v2743_v62 }
 0x78b   :  { %v2748_v2 = vsel %vm2746_vm8, %v2747_v63, %v2745_v1 }
 0x78c   :  { %v2750_v48 = vadd.f32 1e-06, %v2748_v2 }
 0x78e   :  { %3341 = vrcp.f32 %v2750_v48 }
 0x797   :  { %v3340_v49 = vpop.eup %3339 }
 0x798   :  { %v2752_v28 = vmul.f32 %v3340_v49, %v2723_v41 }
 0x79a   :  { %v2759_v50 = vmul.f32 %v3081_v52, %v2752_v28 }
 0x79b   :  { %v3342_v3 = vpop.eup %3341 }
 0x79c   :  { %v2754_v5 = vmul.f32 %v3342_v3, %v2724_v47  ;;  %v2765_v14 = vadd.f32 %v3082_v15, %v2759_v50 }
 0x79e   :  { %v2760_v13 = vmul.f32 %v3081_v52, %v2754_v5 }
 0x7a0   :  { %v2766_v36 = vadd.f32 %v3082_v15, %v2760_v13  ;;  %v3092_v15 = vld [vmem:[#allocation7 + $0x6] ss:$0 sm:$0xff] }
 0x7a2   :  { %v2767_v8 = vpack.c.bf16 %v2766_v36, %v2765_v14 }
 0x7a4   :  { %3242 = vmatmul.mubr.msk.bf16.vlgmr.msra.gmra.mxu0 %vm81_vm1, %v2767_v8 }
 0x7a5   :  { %3257 = vmatprep.mubr.msk.bf16.mxu0 %vm3447_vm0, %v3446_v0  ;;  %3254 = vmatpush3.bf16.msra.mxu0 %v3301_v43 }
 0x7a6   :  { %3255 = vmatprep.subr.bf16.mxu0 %v3446_v0 }
 0x7a9   :  { %3256 = vmatpush3.bf16.msra.mxu0 %v3302_v9 }
 0x864   :  { %v2826_v24 = vpop.f32.mrf.mxu0 }
 0x865   :  { %v2827_v26 = vadd.f32 %v3083_v22, %v2826_v24 }
 0x866   :  { %v3243_v25 = vpop.f32.mrf.mxu0 }
 0x867   :  { %v2833_v12 = vmax.f32 %v2827_v26, 0.0 }
 0x868   :  { %v2829_v16 = vpop.f32.mrf.mxu0 }
 0x869   :  { %v2830_v27 = vadd.f32 %v3083_v22, %v2829_v16 }
 0x86a   :  { %v3244_v29 = vpop.f32.mrf.mxu0 }
 0x86b   :  { %v2834_v19 = vmax.f32 %v2830_v27, 0.0 }
 0x86d   :  { %v2835_v21 = vpack.c.bf16 %v2834_v19, %v2833_v12 }
 0x86f   :  { %2841 = vrot.lane.b32.xlu1 %v2835_v21, %s3451_s4  ;;  %3258 = vmatmul.mubr.msk.bf16.vlgmr.msra.gmra.mxu0 %vm81_vm1, %v2835_v21 }
 0x8e1   :  { %v2842_v11 = vpop.permute.xlu1 %2841 }
 0x8e2   :  { %3250 = vmatmul.mubr.msk.bf16.vlgmr.msra.gmra.mxu1 %vm81_vm1, %v2842_v11 }
 0x92f   :  { %v2942_v0 = vpop.f32.mrf.mxu0 }
 0x931   :  { %v3259_v30 = vpop.f32.mrf.mxu0 }
 0x933   :  { %v2945_v33 = vpop.f32.mrf.mxu0 }
 0x935   :  { %v3260_v4 = vpop.f32.mrf.mxu0 }
 0x9a2   :  { %v2896_v7 = vpop.f32.mrf.mxu1 }
 0x9a3   :  { %v2943_v37 = vadd.f32 %v2942_v0, %v2896_v7 }
 0x9a4   :  { %v3251_v38 = vpop.f32.mrf.mxu1 }
 0x9a5   :  { %v2954_v39 = vadd.f32 %v3091_v35, %v2943_v37 }
 0x9a6   :  { %v2899_v44 = vpop.f32.mrf.mxu1 }
 0x9a7   :  { %v2946_v45 = vadd.f32 %v2945_v33, %v2899_v44  ;;  %v2956_v6 = vadd.f32 %v2954_v39, %v2765_v14  ;;  %v3093_v14 = vld [vmem:[#allocation7 + $0x7] ss:$0 sm:$0xff] }
 0x9a8   :  { %v3252_v41 = vpop.f32.mrf.mxu1 }
 0x9a9   :  { %v2955_v31 = vadd.f32 %v3091_v35, %v2946_v45  ;;  %v2960_v32 = vsel %vm81_vm1, %v2956_v6, 0.0 }
 0x9aa   :  { %2961 = vadd.xlane.f32.xlu0 %v2960_v32 }
 0x9ab   :  { %v2957_v46 = vadd.f32 %v2955_v31, %v2766_v36 }
 0x9ad   :  { %v2963_v47 = vsel %vm81_vm1, %v2957_v46, 0.0 }
 0x9ae   :  { %2964 = vadd.xlane.f32.xlu1 %v2963_v47 }
 0xa33   :  { %v2962_v17 = vpop.xlane.xlu0 %2961 }
 0xa34   :  { %v2966_v18 = vmul.f32 0.03125, %v2962_v17 }
 0xa36   :  { %v2968_v40 = vsub.f32 %v2956_v6, %v2966_v18 }
 0xa37   :  { %v2965_v51 = vpop.xlane.xlu1 %2964 }
 0xa38   :  { %v2967_v34 = vmul.f32 0.03125, %v2965_v51  ;;  %v2970_v23 = vmul.f32 %v2968_v40, %v2968_v40 }
 0xa3a   :  { %v2969_v53 = vsub.f32 %v2957_v46, %v2967_v34  ;;  %v2972_v54 = vsel %vm81_vm1, %v2970_v23, 0.0 }
 0xa3b   :  { %2973 = vadd.xlane.f32.xlu0 %v2972_v54 }
 0xa3c   :  { %v2971_v55 = vmul.f32 %v2969_v53, %v2969_v53 }
 0xa3e   :  { %v2975_v56 = vsel %vm81_vm1, %v2971_v55, 0.0 }
 0xa3f   :  { %2976 = vadd.xlane.f32.xlu0 %v2975_v56 }
 0xac4   :  { %v2974_v57 = vpop.xlane.xlu0 %2973 }
 0xac5   :  { %v2978_v58 = vmul.f32 0.032258064, %v2974_v57 }
 0xac7   :  { %3343 = vrsqrt.f32 %v2978_v58  ;;  %vm2982_vm9 = vcmp.eq.f32.partialorder %v2978_v58, inf  ;;  %v2985_v62 = vand.u32 2147483648, %v2978_v58  ;;  %vm2984_vm10 = vcmp.eq.f32.partialorder %v2978_v58, 0.0 }
 0xac8   :  { %v2977_v59 = vpop.xlane.xlu0 %2976 }
 0xac9   :  { %v2979_v42 = vmul.f32 0.032258064, %v2977_v59 }
 0xacb   :  { %3345 = vrsqrt.f32 %v2979_v42  ;;  %vm2989_vm11 = vcmp.eq.f32.partialorder %v2979_v42, inf  ;;  %v2992_v28 = vand.u32 2147483648, %v2979_v42  ;;  %vm2991_vm12 = vcmp.eq.f32.partialorder %v2979_v42, 0.0 }
 0xad4   :  { %v3344_v60 = vpop.eup %3343 }
 0xad5   :  { %v2981_v61 = vmul.f32 %v3344_v60, %v2978_v58 }
 0xad7   :  { %v2983_v63 = vsel %vm2982_vm9, %v2978_v58, %v2981_v61 }
 0xad8   :  { %v3346_v1 = vpop.eup %3345  ;;  %v2986_v2 = vsel %vm2984_vm10, %v2985_v62, %v2983_v63 }
 0xad9   :  { %v2994_v48 = vadd.f32 1e-06, %v2986_v2  ;;  %v2988_v49 = vmul.f32 %v3346_v1, %v2979_v42 }
 0xadb   :  { %3347 = vrcp.f32 %v2994_v48  ;;  %v2990_v52 = vsel %vm2989_vm11, %v2979_v42, %v2988_v49 }
 0xadc   :  { %v2993_v3 = vsel %vm2991_vm12, %v2992_v28, %v2990_v52 }
 0xadd   :  { %v2995_v5 = vadd.f32 1e-06, %v2993_v3 }
 0xadf   :  { %3349 = vrcp.f32 %v2995_v5 }
 0xae8   :  { %v3348_v50 = vpop.eup %3347 }
 0xae9   :  { %v2997_v13 = vmul.f32 %v3348_v50, %v2968_v40 }
 0xaeb   :  { %v3004_v36 = vmul.f32 %v3092_v15, %v2997_v13 }
 0xaec   :  { %v3350_v8 = vpop.eup %3349 }
 0xaed   :  { %v2999_v43 = vmul.f32 %v3350_v8, %v2969_v53  ;;  %v3010_v9 = vadd.f32 %v3093_v14, %v3004_v36 }
 0xaef   :  { %v3005_v10 = vmul.f32 %v3092_v15, %v2999_v43  ;;  %3012 = vst.msk [vmem:[#allocation8] sm:$0xff] %vm81_vm1, %v3010_v9 }
 0xaf1   :  { %v3011_v20 = vadd.f32 %v3093_v14, %v3005_v10 }
 0xaf3   :  { %3013 = vst.msk [vmem:[#allocation8 + $0x8] sm:$0xff] %vm81_vm1, %v3011_v20 }
 0xaf4   :  { %3424 = shalt.err (!%p3421_p5)
}
 0xaf5   :  { %3025 = dma.vmem_to_hbm [thread:$0]  %s3020_s8, 256, %s3935_s3, [#allocation4], %s3443_s22, %s3443_s22, %s3444_s23  }
 0xaf6   :  { %3437 = dma.done.wait [#allocation4], 256  }
 0xaf7   :  { %3438 = vsyncadd [#allocation4], 4294967040 }
 0xaf8   :  { %3029 = vsyncpa [#allocation3], 1 }
 0xaf9   :  { %3030 = vsyncpa [#allocation6], 1 }
 0xafa   :  { %3031 = vsyncpa [#allocation4], 1 }

</bundles_post_ra>
